<compile_context>
chip_gen: v7x
topology: tpu7x:2x2x1
jax: 0.10.0
libtpu: 0.0.40
codegen_flags: <defaults>
</compile_context>

<pallas_src>
import functools

import jax
import jax.numpy as jnp
from jax.experimental import pallas as pl
from jax.experimental.pallas import tpu as pltpu

_LANE = 128
_SUBLANE = 8
# VMEM working-set budget used for tile selection.  Chosen v7x-safe (64 MiB
# physical per TensorCore) so the same policy also works on v5e/v6e (128 MiB).
_VMEM_TILE_BUDGET = 48 * 1024 * 1024
_VMEM_LIMIT_FLOOR = 32 * 1024 * 1024   # above default scoped limits everywhere
_VMEM_LIMIT_CEIL = 60 * 1024 * 1024    # stays under v7x's 64 MiB physical


def _round_up(n, m):
    return (n + m - 1) // m * m


def _make_kernel(use_bf16_matmul):
    """Build the fused MLP kernel body with the chosen MXU input precision."""
    if use_bf16_matmul:
        # bf16 MXU inputs, f32 accumulation.  Weights are pre-cast in the
        # wrapper; only the activation operand is cast here (VPU, cheap).
        def dot(a, b):
            return jnp.dot(a.astype(jnp.bfloat16), b.astype(jnp.bfloat16),
                           preferred_element_type=jnp.float32)
    else:
        # True f32 matmul (multi-pass MXU) to guarantee the 1e-5 budget.
        def dot(a, b):
            return jnp.dot(a, b, preferred_element_type=jnp.float32,
                           precision=jax.lax.Precision.HIGHEST)

    def kernel(x_ref, w1_ref, b1_ref, w2_ref, b2_ref, w3_ref, b3_ref, o_ref):
        # Imputer: NaN -> 0 (VPU elementwise, f32).
        x = x_ref[...]
        x = jnp.where(jnp.isnan(x), jnp.zeros_like(x), x)
        # linear1 + tanh.  Bias add / tanh stay f32 (v5e has no bf16 VPU/EUP).
        h = jnp.tanh(dot(x, w1_ref[...]) + b1_ref[...])
        # linear2 + tanh
        h = jnp.tanh(dot(h, w2_ref[...]) + b2_ref[...])
        # linear3 (no activation)
        o_ref[...] = (dot(h, w3_ref[...]) + b3_ref[...]).astype(o_ref.dtype)

    return kernel


def _tile_working_set_bytes(tile_b, sites_pad, latent_pad, buffer_count,
                            weight_bytes, out_itemsize):
    """Estimate VMEM working set for one pipelined batch tile."""
    x_bufs = buffer_count * tile_b * sites_pad * 4          # pipelined x tiles
    out_bufs = buffer_count * tile_b * sites_pad * out_itemsize  # pipelined out tiles
    inter = tile_b * sites_pad * 4 + 2 * tile_b * latent_pad * 4  # imputed x + h1/h2
    return x_bufs + out_bufs + inter + weight_bytes


def _pick_tile_b(B, sites_pad, latent_pad, buffer_count, weight_bytes, out_itemsize):
    """Pick a batch tile: VMEM-budgeted, megacore-friendly, overhead-aware."""
    def fits(tb):
        return _tile_working_set_bytes(tb, sites_pad, latent_pad, buffer_count,
                                       weight_bytes, out_itemsize) <= _VMEM_TILE_BUDGET

    if B <= 128:
        # Split into 2 parallel grid steps (one per v7x TensorCore) only when
        # per-step MXU work dominates the ~0.35 us grid-step overhead.
        half_flops = (B // 2) * 2 * (sites_pad * latent_pad
                                     + latent_pad * latent_pad
                                     + latent_pad * sites_pad)
        if B % 16 == 0 and half_flops >= 4_000_000 and fits(B // 2):
            return B // 2            # multiple of 8 sublanes by construction
        return B                     # single block: overhead would dominate

    # Prefer 512-row tiles (~85% of HBM roofline measured; 1024 is marginal and
    # risks VMEM on v7x).  Keep >= 2 grid steps; prefer an even step count so
    # both v7x TensorCores stay balanced under dimension_semantics=parallel.
    candidates = (512, 1024, 256, 128, 64, 32, 16, 8)
    for require_even_steps in (True, False):
        for cand in candidates:
            if B % cand != 0:
                continue
            steps = B // cand
            if steps < 2 or (require_even_steps and steps % 2 != 0):
                continue
            if fits(cand):
                return cand
    return B  # fallback: single block


def _pad_params(params, sites_pad, latent_pad, weight_dtype):
    """Zero-pad weights/biases to lane-multiple feature dims (math-preserving)."""
    def pad2(a, rows, cols):
        return jnp.pad(a, ((0, rows - a.shape[0]), (0, cols - a.shape[1])))

    w1 = pad2(params["w1"], sites_pad, latent_pad).astype(weight_dtype)
    b1 = pad2(params["b1"], 1, latent_pad)                       # bias stays f32
    w2 = pad2(params["w2"], latent_pad, latent_pad).astype(weight_dtype)
    b2 = pad2(params["b2"], 1, latent_pad)
    w3 = pad2(params["w3"], latent_pad, sites_pad).astype(weight_dtype)
    b3 = pad2(params["b3"], 1, sites_pad)
    return w1, b1, w2, b2, w3, b3


def recsys_forward(x, params, *, tile_b=None, use_bf16_matmul=False,
                   out_dtype=jnp.float32, buffer_count=None):
    """Forward pass of the recsys MLP as a single fused Pallas kernel.

    x:       [B, sites] float32 (may contain NaN -> treated as 0)
    params:  dict with w1 [sites, latent], b1 [1, latent],
                       w2 [latent, latent], b2 [1, latent],
                       w3 [latent, sites],  b3 [1, sites]
    use_bf16_matmul: feed the MXU bf16 operands (f32 accumulation) -- 2-3x on
             matmul-bound configs; only enable if the accuracy budget allows.
    out_dtype: emit bf16 output to halve writeback bytes if consumers allow.
    returns: [B, sites] in out_dtype
    """
    B, sites = x.shape
    latent = params["w1"].shape[1]

    # Pad feature dims to lane multiples (128): avoids lane-sparse h
    # intermediates and masked partial (vst.msk) output stores.
    sites_pad = _round_up(sites, _LANE)
    latent_pad = _round_up(latent, _LANE)

    weight_dtype = jnp.bfloat16 if use_bf16_matmul else jnp.float32
    w1, b1, w2, b2, w3, b3 = _pad_params(params, sites_pad, latent_pad, weight_dtype)
    weight_bytes = sum(int(a.size) * a.dtype.itemsize for a in (w1, b1, w2, b2, w3, b3))
    out_itemsize = jnp.dtype(out_dtype).itemsize

    # TODO(synk): if the weight set ever exceeds the v7x VMEM budget, block
    # w1 (K-chunks over sites, with a pl.when-init'd f32 accumulator) and w3
    # (N-chunks over sites) instead of full VMEM residency.

    if sites_pad != sites:
        x = jnp.pad(x, ((0, 0), (0, sites_pad - sites)))

    if tile_b is None:
        tile_b = _pick_tile_b(B, sites_pad, latent_pad, 2, weight_bytes, out_itemsize)
    else:
        assert tile_b == B or (tile_b % _SUBLANE == 0 and B % tile_b == 0), (
            "user tile_b must equal B or be a multiple of 8 that divides B")
    assert B % tile_b == 0, "batch must be divisible by tile_b"
    n_steps = B // tile_b

    if buffer_count is None:
        # Skinny MLP => HBM-streaming bound on x/out; deepen the pipeline if
        # it still fits the VMEM budget.  Sweepable (2 vs 3).
        if (n_steps >= 4 and latent_pad <= 256 and
                _tile_working_set_bytes(tile_b, sites_pad, latent_pad, 3,
                                        weight_bytes, out_itemsize)
                <= _VMEM_TILE_BUDGET):
            buffer_count = 3
        else:
            buffer_count = 2

    io_kwargs = {}
    if buffer_count != 2:  # 2 is the default pipeline depth; only override if deeper
        io_kwargs = dict(pipeline_mode=pl.Buffered(buffer_count))
    x_spec = pl.BlockSpec((tile_b, sites_pad), lambda i: (i, 0), **io_kwargs)
    o_spec = pl.BlockSpec((tile_b, sites_pad), lambda i: (i, 0), **io_kwargs)

    # Weights / biases: whole tensor resident in VMEM, NOT part of the
    # pipelined (double-buffered) path -- their block never changes.
    vmem_full = pl.BlockSpec(memory_space=pltpu.MemorySpace.VMEM)

    # Explicit scoped-VMEM limit: the defaults (16 MiB v5e / 32 MiB v6e, v7x)
    # are far below physical and would block the intended large tiles.
    est = _tile_working_set_bytes(tile_b, sites_pad, latent_pad, buffer_count,
                                  weight_bytes, out_itemsize)
    vmem_limit = int(min(max(est * 1.25, _VMEM_LIMIT_FLOOR), _VMEM_LIMIT_CEIL))

    flops_per_row = 2 * (sites_pad * latent_pad + latent_pad * latent_pad
                         + latent_pad * sites_pad)
    cost = pl.CostEstimate(
        flops=B * flops_per_row,
        transcendentals=2 * B * latent_pad,
        bytes_accessed=B * sites_pad * 4 + B * sites_pad * out_itemsize + weight_bytes,
    )

    out = pl.pallas_call(
        _make_kernel(use_bf16_matmul),
        out_shape=jax.ShapeDtypeStruct((B, sites_pad), out_dtype),
        grid_spec=pltpu.PrefetchScalarGridSpec(
            num_scalar_prefetch=0,
            grid=(n_steps,),
            in_specs=[
                x_spec,      # x tile (pipelined over the batch)
                vmem_full,   # w1
                vmem_full,   # b1
                vmem_full,   # w2
                vmem_full,   # b2
                vmem_full,   # w3
                vmem_full,   # b3
            ],
            out_specs=o_spec,
        ),
        compiler_params=pltpu.CompilerParams(
            dimension_semantics=("parallel",),
            vmem_limit_bytes=vmem_limit,
        ),
        cost_estimate=cost,
    )(x, w1, b1, w2, b2, w3, b3)

    if sites_pad != sites:
        out = out[:, :sites]
    return out


def init_params(key, sites, latent):
    """Deterministic init mimicking nn.Linear's uniform(-1/sqrt(fan_in), +)."""
    ks = jax.random.split(key, 6)

    def lin(kw, kb, fan_in, fan_out):
        bound = 1.0 / jnp.sqrt(fan_in)
        w = jax.random.uniform(kw, (fan_in, fan_out), jnp.float32, -bound, bound)
        b = jax.random.uniform(kb, (1, fan_out), jnp.float32, -bound, bound)
        return w, b

    w1, b1 = lin(ks[0], ks[1], sites, latent)
    w2, b2 = lin(ks[2], ks[3], latent, latent)
    w3, b3 = lin(ks[4], ks[5], latent, sites)
    return {"w1": w1, "b1": b1, "w2": w2, "b2": b2, "w3": w3, "b3": b3}


def reference_forward(x, params):
    x = jnp.where(jnp.isnan(x), 0.0, x)
    h = jnp.tanh(x @ params["w1"] + params["b1"])
    h = jnp.tanh(h @ params["w2"] + params["b2"])
    return h @ params["w3"] + params["b3"]


if __name__ == "__main__":
    # Small shapes consistent with the module's forward:
    # batch of users = 16, sites = 128, latent_features = 32
    B, SITES, LATENT = 16, 128, 32

    key = jax.random.PRNGKey(0)
    k_x, k_p = jax.random.split(key)

    x = jax.random.normal(k_x, (B, SITES), jnp.float32)
    # sprinkle some NaNs to exercise the in-kernel imputer
    x = x.at[0, 3].set(jnp.nan).at[5, 100].set(jnp.nan).at[11, 0].set(jnp.nan)

    params = init_params(k_p, SITES, LATENT)

    out = recsys_forward(x, params)   # tiny B -> single block, grid=(1,)
    out = jax.block_until_ready(out)

    ref = reference_forward(x, params)
    assert out.shape == (B, SITES)
    assert bool(jnp.all(jnp.isfinite(out)))
    assert bool(jnp.allclose(out, ref, atol=1e-5, rtol=1e-5))

    # NOTE: fit()/custom_loss (training loop, Adam, file I/O) are not part of
    # the forward pass and are intentionally not kernelized.
    print("KERNEL_OK")
</pallas_src>

<mosaic_0001>
module attributes {stable_mosaic.version = 11 : i64} {
  func.func @kernel(%arg0: i32, %arg1: memref<16x128xf32, #tpu.memory_space<vmem>>, %arg2: memref<128x128xf32, #tpu.memory_space<vmem>>, %arg3: memref<1x128xf32, #tpu.memory_space<vmem>>, %arg4: memref<128x128xf32, #tpu.memory_space<vmem>>, %arg5: memref<1x128xf32, #tpu.memory_space<vmem>>, %arg6: memref<128x128xf32, #tpu.memory_space<vmem>>, %arg7: memref<1x128xf32, #tpu.memory_space<vmem>>, %arg8: memref<16x128xf32, #tpu.memory_space<vmem>>) attributes {dimension_semantics = [#tpu.dimension_semantics<parallel>], iteration_bounds = array<i64: 1>, scalar_prefetch = 0 : i64, scratch_operands = 0 : i64, tpu.core_type = #tpu.core_type<tc>, window_params = [{transform_indices = @transform_0, window_bounds = array<i64: 16, 128>}, {pipeline_mode = #tpu.pipeline_mode<synchronous>, transform_indices = @transform_1, window_bounds = array<i64: 128, 128>}, {pipeline_mode = #tpu.pipeline_mode<synchronous>, transform_indices = @transform_2, window_bounds = array<i64: 1, 128>}, {pipeline_mode = #tpu.pipeline_mode<synchronous>, transform_indices = @transform_3, window_bounds = array<i64: 128, 128>}, {pipeline_mode = #tpu.pipeline_mode<synchronous>, transform_indices = @transform_4, window_bounds = array<i64: 1, 128>}, {pipeline_mode = #tpu.pipeline_mode<synchronous>, transform_indices = @transform_5, window_bounds = array<i64: 128, 128>}, {pipeline_mode = #tpu.pipeline_mode<synchronous>, transform_indices = @transform_6, window_bounds = array<i64: 1, 128>}, {transform_indices = @transform_7, window_bounds = array<i64: 16, 128>}]} {
    %c0 = arith.constant 0 : index
    %c0_0 = arith.constant 0 : index
    %0 = vector.load %arg1[%c0, %c0_0] : memref<16x128xf32, #tpu.memory_space<vmem>>, vector<16x128xf32>
    %1 = arith.cmpf one, %0, %0 : vector<16x128xf32>
    %cst = arith.constant 0.000000e+00 : f32
    %2 = vector.broadcast %cst : f32 to vector<16x128xf32>
    %3 = arith.select %1, %2, %0 : vector<16x128xi1>, vector<16x128xf32>
    %c0_1 = arith.constant 0 : index
    %c0_2 = arith.constant 0 : index
    %4 = vector.load %arg2[%c0_1, %c0_2] : memref<128x128xf32, #tpu.memory_space<vmem>>, vector<128x128xf32>
    %cst_3 = arith.constant dense<0.000000e+00> : vector<16x128xf32>
    %5 = tpu.matmul %3, %4, %cst_3 {dimension_numbers = #tpu.dot_dimension_numbers<[1], [0], [0], [1], [0, 0, 1, 1], [], []>, precision = #tpu.contract_precision<fp32>} : vector<16x128xf32>, vector<128x128xf32>, vector<16x128xf32> -> vector<16x128xf32>
    %c0_4 = arith.constant 0 : index
    %c0_5 = arith.constant 0 : index
    %6 = vector.load %arg3[%c0_4, %c0_5] : memref<1x128xf32, #tpu.memory_space<vmem>>, vector<1x128xf32>
    %7 = vector.broadcast %6 : vector<1x128xf32> to vector<16x128xf32>
    %8 = arith.addf %5, %7 : vector<16x128xf32>
    %9 = math.tanh %8 : vector<16x128xf32>
    %c0_6 = arith.constant 0 : index
    %c0_7 = arith.constant 0 : index
    %10 = vector.load %arg4[%c0_6, %c0_7] : memref<128x128xf32, #tpu.memory_space<vmem>>, vector<128x128xf32>
    %cst_8 = arith.constant dense<0.000000e+00> : vector<16x128xf32>
    %11 = tpu.matmul %9, %10, %cst_8 {dimension_numbers = #tpu.dot_dimension_numbers<[1], [0], [0], [1], [0, 0, 1, 1], [], []>, precision = #tpu.contract_precision<fp32>} : vector<16x128xf32>, vector<128x128xf32>, vector<16x128xf32> -> vector<16x128xf32>
    %c0_9 = arith.constant 0 : index
    %c0_10 = arith.constant 0 : index
    %12 = vector.load %arg5[%c0_9, %c0_10] : memref<1x128xf32, #tpu.memory_space<vmem>>, vector<1x128xf32>
    %13 = vector.broadcast %12 : vector<1x128xf32> to vector<16x128xf32>
    %14 = arith.addf %11, %13 : vector<16x128xf32>
    %15 = math.tanh %14 : vector<16x128xf32>
    %c0_11 = arith.constant 0 : index
    %c0_12 = arith.constant 0 : index
    %16 = vector.load %arg6[%c0_11, %c0_12] : memref<128x128xf32, #tpu.memory_space<vmem>>, vector<128x128xf32>
    %cst_13 = arith.constant dense<0.000000e+00> : vector<16x128xf32>
    %17 = tpu.matmul %15, %16, %cst_13 {dimension_numbers = #tpu.dot_dimension_numbers<[1], [0], [0], [1], [0, 0, 1, 1], [], []>, precision = #tpu.contract_precision<fp32>} : vector<16x128xf32>, vector<128x128xf32>, vector<16x128xf32> -> vector<16x128xf32>
    %c0_14 = arith.constant 0 : index
    %c0_15 = arith.constant 0 : index
    %18 = vector.load %arg7[%c0_14, %c0_15] : memref<1x128xf32, #tpu.memory_space<vmem>>, vector<1x128xf32>
    %19 = vector.broadcast %18 : vector<1x128xf32> to vector<16x128xf32>
    %20 = arith.addf %17, %19 : vector<16x128xf32>
    %c0_16 = arith.constant 0 : index
    %c0_17 = arith.constant 0 : index
    %21 = vector.load %arg8[%c0_16, %c0_17] : memref<16x128xf32, #tpu.memory_space<vmem>>, vector<16x128xf32>
    tpu.vector_store %arg8[%c0_16, %c0_17], %20 {strides = array<i32>} : memref<16x128xf32, #tpu.memory_space<vmem>>, vector<16x128xf32>,
    return
  }
  func.func @transform_0(%arg0: i32) -> (i32, i32) {
    %c0_i32 = arith.constant 0 : i32
    %c0_i32_0 = arith.constant 0 : i32
    return %arg0, %c0_i32 : i32, i32
  }
  func.func @transform_1(%arg0: i32) -> (i32, i32) {
    %c0_i32 = arith.constant 0 : i32
    %c0_i32_0 = arith.constant 0 : i32
    %c0_i32_1 = arith.constant 0 : i32
    return %c0_i32, %c0_i32_0 : i32, i32
  }
  func.func @transform_2(%arg0: i32) -> (i32, i32) {
    %c0_i32 = arith.constant 0 : i32
    %c0_i32_0 = arith.constant 0 : i32
    %c0_i32_1 = arith.constant 0 : i32
    return %c0_i32, %c0_i32_0 : i32, i32
  }
  func.func @transform_3(%arg0: i32) -> (i32, i32) {
    %c0_i32 = arith.constant 0 : i32
    %c0_i32_0 = arith.constant 0 : i32
    %c0_i32_1 = arith.constant 0 : i32
    return %c0_i32, %c0_i32_0 : i32, i32
  }
  func.func @transform_4(%arg0: i32) -> (i32, i32) {
    %c0_i32 = arith.constant 0 : i32
    %c0_i32_0 = arith.constant 0 : i32
    %c0_i32_1 = arith.constant 0 : i32
    return %c0_i32, %c0_i32_0 : i32, i32
  }
  func.func @transform_5(%arg0: i32) -> (i32, i32) {
    %c0_i32 = arith.constant 0 : i32
    %c0_i32_0 = arith.constant 0 : i32
    %c0_i32_1 = arith.constant 0 : i32
    return %c0_i32, %c0_i32_0 : i32, i32
  }
  func.func @transform_6(%arg0: i32) -> (i32, i32) {
    %c0_i32 = arith.constant 0 : i32
    %c0_i32_0 = arith.constant 0 : i32
    %c0_i32_1 = arith.constant 0 : i32
    return %c0_i32, %c0_i32_0 : i32, i32
  }
  func.func @transform_7(%arg0: i32) -> (i32, i32) {
    %c0_i32 = arith.constant 0 : i32
    %c0_i32_0 = arith.constant 0 : i32
    return %arg0, %c0_i32 : i32, i32
  }
}

</mosaic_0001>

<bundles_post_ra>
// kernel: tpu_custom_call.1
= control target key start
LH: loop header
LB: loop body
LE: loop exit
PB: predicated region body
PF: predicated region fallthrough
CT: control target
= control target key end

     0   :  { %12 = vsyncpa [#allocation3], 0  ;;  %s4922_s0 = inlined_call_operand.hbm [shape: f32[16,128], index: 0, kind: input, shape index: {}]   ;;  %s4923_s1 = inlined_call_operand.hbm [shape: f32[128,128], index: 1, kind: input, shape index: {}]   ;;  %s4924_s2 = inlined_call_operand.vmem [shape: f32[1,128], index: 2, kind: input, shape index: {}]   ;;  %s4925_s3 = inlined_call_operand.hbm [shape: f32[128,128], index: 3, kind: input, shape index: {}]   ;;  %s4926_s4 = inlined_call_operand.vmem [shape: f32[1,128], index: 4, kind: input, shape index: {}]   ;;  %s4927_s5 = inlined_call_operand.hbm [shape: f32[128,128], index: 5, kind: input, shape index: {}]   ;;  %s4928_s6 = inlined_call_operand.vmem [shape: f32[1,128], index: 6, kind: input, shape index: {}]   ;;  %s4929_s7 = inlined_call_operand.hbm [shape: f32[16,128], index: 7, kind: output, shape index: {}]  }
   0x1   :  { %13 = vsyncpa [#allocation6], 0 }
   0x2   :  { %14 = vsyncpa [#allocation9], 0 }
   0x3   :  { %15 = vsyncpa [#allocation4], 0  ;;  %s3936_s24 = smov [#allocation5]   ;;  %s3937_s26 = smov [#allocation2]  }
   0x4   :  { %s33_s25 = sshll.u32 %s3936_s24, 4  ;;  %s21_s27 = sshll.u32 %s3937_s26, 4  ;;  %s34_s25 = int_to_ptr.vmem [resolvable:$true] %s33_s25  ;;  %s3983_s27 = int_to_ptr.vmem [resolvable:$true] %s21_s27 }
   0x5   :  { %s3818_s30 = scalar_lea.hbm %s4923_s1, 2048 }
   0x6   :  { %p3819_p0 = scmp.ne.s32.totalorder %s4923_s1, %s3818_s30  ;;  %p3822_p1 = scmp.lt.u32.totalorder %s3818_s30, %s4923_s1 }
   0x8   :  { %p3824_p2 = pnand %p3822_p1, %p3819_p0 }
   0xa   :  { %3827 = shalt.err (!%p3824_p2)
}
   0xb   :  { %s3828_s12 = scalar_lea.vmem %s34_s25, 2048  ;;  %p3833_p4 = scmp.lt.s32.totalorder %s34_s25, %s34_s25 }
   0xc   :  { %p3829_p3 = scmp.ne.s32.totalorder %s34_s25, %s3828_s12  ;;  %p3834_p5 = scmp.lt.s32.totalorder %s3828_s12, %s3828_s12 }
   0xe   :  { %p3835_p6 = por %p3834_p5, %p3833_p4 }
  0x10   :  { %p3836_p7 = pnand %p3835_p6, %p3829_p3 }
  0x12   :  { %3839 = shalt.err (!%p3836_p7)
}
  0x13   :  { %s3938_s13 = smov 128   ;;  %s3939_s14 = smov 8  }
  0x14   :  { %39 = dma.hbm_to_vmem [thread:$0]  %s4923_s1, 2048, %s34_s25, [#allocation6], %s3938_s13, %s3938_s13, %s3939_s14  }
  0x15   :  { %s3840_s19 = scalar_lea.hbm %s4922_s0, 256 }
  0x16   :  { %p3841_p8 = scmp.ne.s32.totalorder %s4922_s0, %s3840_s19  ;;  %p3844_p9 = scmp.lt.u32.totalorder %s3840_s19, %s4922_s0 }
  0x18   :  { %p3846_p10 = pnand %p3844_p9, %p3841_p8 }
  0x1a   :  { %3849 = shalt.err (!%p3846_p10)
}
  0x1b   :  { %s3850_s24 = scalar_lea.vmem %s3983_s27, 256  ;;  %p3855_p12 = scmp.lt.s32.totalorder %s3983_s27, %s3983_s27 }
  0x1c   :  { %p3851_p11 = scmp.ne.s32.totalorder %s3983_s27, %s3850_s24  ;;  %p3856_p13 = scmp.lt.s32.totalorder %s3850_s24, %s3850_s24 }
  0x1e   :  { %p3857_p0 = por %p3856_p13, %p3855_p12 }
  0x20   :  { %p3858_p1 = pnand %p3857_p0, %p3851_p11 }
  0x22   :  { %3861 = shalt.err (!%p3858_p1)
}
  0x23   :  { %27 = dma.hbm_to_vmem [thread:$0]  %s4922_s0, 256, %s3983_s27, [#allocation3], %s3938_s13, %s3938_s13, %s3939_s14  }
  0x24   :  { %s3940_s26 = smov [#allocation7]   ;;  %s3941_s29 = smov [#allocation8]  }
  0x25   :  { %s47_s28 = sshll.u32 %s3940_s26, 4  ;;  %s61_s30 = sshll.u32 %s3941_s29, 4  ;;  %s48_s28 = int_to_ptr.vmem [resolvable:$true] %s47_s28  ;;  %s4020_s30 = int_to_ptr.vmem [resolvable:$true] %s61_s30 }
  0x26   :  { %s3862_s10 = scalar_lea.hbm %s4925_s3, 2048 }
  0x27   :  { %p3863_p2 = scmp.ne.s32.totalorder %s4925_s3, %s3862_s10  ;;  %p3866_p3 = scmp.lt.u32.totalorder %s3862_s10, %s4925_s3 }
  0x29   :  { %p3868_p4 = pnand %p3866_p3, %p3863_p2 }
  0x2b   :  { %3871 = shalt.err (!%p3868_p4)
}
  0x2c   :  { %s3872_s0 = scalar_lea.vmem %s48_s28, 2048  ;;  %p3877_p6 = scmp.lt.s32.totalorder %s48_s28, %s48_s28 }
  0x2d   :  { %p3873_p5 = scmp.ne.s32.totalorder %s48_s28, %s3872_s0  ;;  %p3878_p7 = scmp.lt.s32.totalorder %s3872_s0, %s3872_s0 }
  0x2f   :  { %p3879_p8 = por %p3878_p7, %p3877_p6 }
  0x31   :  { %p3880_p9 = pnand %p3879_p8, %p3873_p5 }
  0x33   :  { %3883 = shalt.err (!%p3880_p9)
}
  0x34   :  { %53 = dma.hbm_to_vmem [thread:$0]  %s4925_s3, 2048, %s48_s28, [#allocation6], %s3938_s13, %s3938_s13, %s3939_s14  }
  0x35   :  { %s3884_s20 = scalar_lea.hbm %s4927_s5, 2048 }
  0x36   :  { %p3885_p10 = scmp.ne.s32.totalorder %s4927_s5, %s3884_s20  ;;  %p3888_p11 = scmp.lt.u32.totalorder %s3884_s20, %s4927_s5 }
  0x38   :  { %p3890_p12 = pnand %p3888_p11, %p3885_p10 }
  0x3a   :  { %3893 = shalt.err (!%p3890_p12)
}
  0x3b   :  { %s3894_s1 = scalar_lea.vmem %s4020_s30, 2048  ;;  %p3899_p0 = scmp.lt.s32.totalorder %s4020_s30, %s4020_s30 }
  0x3c   :  { %p3895_p13 = scmp.ne.s32.totalorder %s4020_s30, %s3894_s1  ;;  %p3900_p1 = scmp.lt.s32.totalorder %s3894_s1, %s3894_s1 }
  0x3e   :  { %p3901_p2 = por %p3900_p1, %p3899_p0 }
  0x40   :  { %p3902_p3 = pnand %p3901_p2, %p3895_p13 }
  0x42   :  { %3905 = shalt.err (!%p3902_p3)
}
  0x43   :  { %67 = dma.hbm_to_vmem [thread:$0]  %s4927_s5, 2048, %s4020_s30, [#allocation9], %s3938_s13, %s3938_s13, %s3939_s14  }
  0x44   :  { %3928 = dma.done.wait [#allocation3], 256  }
  0x45   :  { %3929 = vsyncadd [#allocation3], 4294967040 }
  0x46   :  { %3930 = dma.done.wait [#allocation6], 4096  }
  0x47   :  { %3931 = vsyncadd [#allocation6], 4294963200 }
  0x48   :  { %3932 = dma.done.wait [#allocation9], 2048  }
  0x49   :  { %3933 = vsyncadd [#allocation9], 4294965248  ;;  %v88_v0 = vld [vmem:[#allocation5] sm:$0xff]  ;;  %v89_v1 = vld [vmem:[#allocation5 + $0x8] sm:$0xff]  ;;  %s3942_s30 = smov [#allocation10]  }
  0x4a   :  { %v90_v2 = vld [vmem:[#allocation5 + $0x10] sm:$0xff]  ;;  %v112_v3 = vand.u32 4294901760, %v88_v0  ;;  %v115_v4 = vand.u32 4294901760, %v89_v1  ;;  %v91_v5 = vld [vmem:[#allocation5 + $0x18] sm:$0xff]  ;;  %v4057_v7 = vld [vmem:[#allocation5 + $0x20] sm:$0xff]  ;;  %s2220_s8 = sshll.u32 %s3942_s30, 4  ;;  %s2221_s8 = int_to_ptr.vmem [resolvable:$true] %s2220_s8 }
  0x4b   :  { %v118_v6 = vand.u32 4294901760, %v90_v2  ;;  %v4059_v8 = vld [vmem:[#allocation5 + $0x28] sm:$0xff]  ;;  %v121_v9 = vand.u32 4294901760, %v91_v5  ;;  %v124_v11 = vand.u32 4294901760, %v4057_v7  ;;  %v4067_v14 = vld [vmem:[#allocation5 + $0x30] sm:$0xff]  ;;  %v4069_v15 = vld [vmem:[#allocation5 + $0x38] sm:$0xff]  ;;  %p3911_p5 = scmp.lt.s32.totalorder %s2221_s8, %s2221_s8 }
  0x4c   :  { %v4061_v10 = vpack.c.bf16 %v115_v4, %v112_v3  ;;  %v127_v12 = vand.u32 4294901760, %v4059_v8  ;;  %v82_v16 = vld [vmem:[#allocation2] sm:$0xff]  ;;  %v130_v18 = vand.u32 4294901760, %v4067_v14  ;;  %v133_v19 = vand.u32 4294901760, %v4069_v15  ;;  %v4085_v21 = vld [vmem:[#allocation5 + $0x40] sm:$0xff]  ;;  %v4087_v22 = vld [vmem:[#allocation5 + $0x48] sm:$0xff] }
  0x4d   :  { %v4065_v13 = vpack.c.bf16 %v121_v9, %v118_v6  ;;  %vm84_vm0 = vcmp.ne.f32.partialorder %v82_v16, %v82_v16  ;;  %v83_v24 = vld [vmem:[#allocation2 + $0x8] sm:$0xff]  ;;  %v136_v27 = vand.u32 4294901760, %v4085_v21  ;;  %v139_v28 = vand.u32 4294901760, %v4087_v22  ;;  %v4106_v29 = vld [vmem:[#allocation5 + $0x50] sm:$0xff]  ;;  %v4128_v39 = vld [vmem:[#allocation5 + $0x60] sm:$0xff]  ;;  %s3906_s9 = scalar_lea.vmem %s2221_s8, 256 }
  0x4e   :  { %3192 = vmatprep.subr.bf16.mxu1 %v4061_v10  ;;  %3288 = vmatprep.subr.bf16.mxu0 %v4061_v10  ;;  %v4081_v17 = vpack.c.bf16 %v127_v12, %v124_v11  ;;  %v86_v20 = vsel %vm84_vm0, 0.0, %v82_v16  ;;  %v4102_v26 = vpack.c.bf16 %v133_v19, %v130_v18  ;;  %vm85_vm1 = vcmp.ne.f32.partialorder %v83_v24, %v83_v24  ;;  %v4108_v30 = vld [vmem:[#allocation5 + $0x58] sm:$0xff]  ;;  %v4130_v40 = vld [vmem:[#allocation5 + $0x68] sm:$0xff]  ;;  %v4138_v44 = vld [vmem:[#allocation5 + $0x70] sm:$0xff]  ;;  %p3907_p4 = scmp.ne.s32.totalorder %s2221_s8, %s3906_s9  ;;  %p3912_p6 = scmp.lt.s32.totalorder %s3906_s9, %s3906_s9 }
  0x4f   :  { %3194 = vmatpush3.bf16.msra.mxu1 %v4061_v10  ;;  %3290 = vmatpush3.bf16.msra.mxu0 %v4061_v10  ;;  %v4089_v23 = vand.u32 4294901760, %v86_v20  ;;  %v4114_v33 = vsub.f32 %v88_v0, %v112_v3  ;;  %v4116_v34 = vsub.f32 %v89_v1, %v115_v4  ;;  %v87_v35 = vsel %vm85_vm1, 0.0, %v83_v24  ;;  %v4154_v51 = vld [vmem:[#allocation5 + $0x78] sm:$0xff] }
  0x50   :  { %3196 = vmatprep.subr.bf16.mxu1 %v4065_v13  ;;  %3292 = vmatprep.subr.bf16.mxu0 %v4065_v13  ;;  %v4124_v36 = vpack.c.bf16 %v139_v28, %v136_v27  ;;  %v142_v37 = vand.u32 4294901760, %v4106_v29  ;;  %v145_v38 = vand.u32 4294901760, %v4108_v30  ;;  %v4132_v42 = vand.u32 4294901760, %v87_v35  ;;  %p3913_p7 = por %p3912_p6, %p3911_p5 }
  0x51   :  { %v4094_v25 = vsub.f32 %v86_v20, %v4089_v23  ;;  %v4134_v43 = vsub.f32 %v90_v2, %v118_v6  ;;  %v215_v45 = vand.u32 4294901760, %v4114_v33  ;;  %v222_v46 = vand.u32 4294901760, %v4116_v34 }
  0x52   :  { %v4142_v47 = vsub.f32 %v91_v5, %v121_v9  ;;  %v4150_v48 = vpack.c.bf16 %v145_v38, %v142_v37  ;;  %v148_v49 = vand.u32 4294901760, %v4128_v39  ;;  %v151_v50 = vand.u32 4294901760, %v4130_v40  ;;  %p3914_p8 = pnand %p3913_p7, %p3907_p4 }
  0x53   :  { %3198 = vmatpush3.bf16.msra.mxu1 %v4065_v13  ;;  %3294 = vmatpush3.bf16.msra.mxu0 %v4065_v13  ;;  %v194_v31 = vand.u32 4294901760, %v4094_v25  ;;  %v154_v52 = vand.u32 4294901760, %v4138_v44  ;;  %v4158_v53 = vsub.f32 %v87_v35, %v4132_v42  ;;  %v229_v54 = vand.u32 4294901760, %v4134_v43 }
  0x54   :  { %3200 = vmatprep.subr.bf16.mxu1 %v4081_v17  ;;  %3296 = vmatprep.subr.bf16.mxu0 %v4081_v17  ;;  %v157_v55 = vand.u32 4294901760, %v4154_v51  ;;  %v216_v56 = vsub.f32 %v4114_v33, %v215_v45  ;;  %v223_v57 = vsub.f32 %v4116_v34, %v222_v46  ;;  %v236_v58 = vand.u32 4294901760, %v4142_v47 }
  0x55   :  { %v195_v32 = vsub.f32 %v4094_v25, %v194_v31  ;;  %2698 = vmatprep.mubr.f32.mxu0 %v194_v31  ;;  %v4173_v59 = vpack.c.bf16 %v151_v50, %v148_v49  ;;  %v4178_v60 = vsub.f32 %v4057_v7, %v124_v11  ;;  %v4183_v61 = vsub.f32 %v4059_v8, %v127_v12 }
  0x56   :  { %v204_v62 = vand.u32 4294901760, %v4158_v53  ;;  %v230_v63 = vsub.f32 %v4134_v43, %v229_v54  ;;  %v4193_v0 = vpack.c.bf16 %v157_v55, %v154_v52  ;;  %v217_v1 = vand.u32 4294901760, %v216_v56 }
  0x57   :  { %3202 = vmatpush3.bf16.msra.mxu1 %v4081_v17  ;;  %3298 = vmatpush3.bf16.msra.mxu0 %v4081_v17  ;;  %v196_v41 = vand.u32 4294901760, %v195_v32  ;;  %v224_v2 = vand.u32 4294901760, %v223_v57  ;;  %v237_v3 = vsub.f32 %v4142_v47, %v236_v58  ;;  %v243_v4 = vand.u32 4294901760, %v4178_v60 }
  0x58   :  { %3204 = vmatprep.subr.bf16.mxu1 %v4102_v26  ;;  %3300 = vmatprep.subr.bf16.mxu0 %v4102_v26  ;;  %v250_v5 = vand.u32 4294901760, %v4183_v61  ;;  %v4203_v6 = vsub.f32 %v4067_v14, %v130_v18  ;;  %v4208_v7 = vsub.f32 %v4069_v15, %v133_v19  ;;  %v3319_v8 = vpack.c.bf16 %v222_v46, %v215_v45 }
  0x59   :  { %2593 = vmatprep.mubr.f32.mxu1 %v196_v41  ;;  %v205_v9 = vsub.f32 %v4158_v53, %v204_v62  ;;  %v231_v11 = vand.u32 4294901760, %v230_v63  ;;  %v3223_v12 = vpack.c.bf16 %v224_v2, %v217_v1  ;;  %v238_v16 = vand.u32 4294901760, %v237_v3 }
  0x5a   :  { %v4216_v14 = vsub.f32 %v4085_v21, %v136_v27  ;;  %v4221_v15 = vsub.f32 %v4087_v22, %v139_v28  ;;  %v244_v18 = vsub.f32 %v4178_v60, %v243_v4  ;;  %v251_v19 = vsub.f32 %v4183_v61, %v250_v5 }
  0x5b   :  { %3206 = vmatpush3.bf16.msra.mxu1 %v4102_v26  ;;  %3302 = vmatpush3.bf16.msra.mxu0 %v4102_v26  ;;  %v257_v20 = vand.u32 4294901760, %v4203_v6  ;;  %v264_v24 = vand.u32 4294901760, %v4208_v7  ;;  %v206_v31 = vand.u32 4294901760, %v205_v9  ;;  %v3323_v21 = vpack.c.bf16 %v236_v58, %v229_v54 }
  0x5c   :  { %3208 = vmatprep.subr.bf16.mxu1 %v4124_v36  ;;  %3304 = vmatprep.subr.bf16.mxu0 %v4124_v36  ;;  %v4232_v27 = vsub.f32 %v4106_v29, %v142_v37  ;;  %v3227_v22 = vpack.c.bf16 %v238_v16, %v231_v11  ;;  %v271_v28 = vand.u32 4294901760, %v4216_v14  ;;  %v278_v32 = vand.u32 4294901760, %v4221_v15 }
  0x5d   :  { %v4241_v35 = vsub.f32 %v4108_v30, %v145_v38  ;;  %v245_v41 = vand.u32 4294901760, %v244_v18  ;;  %v252_v45 = vand.u32 4294901760, %v251_v19  ;;  %v258_v29 = vsub.f32 %v4203_v6, %v257_v20 }
  0x5e   :  { %v265_v37 = vsub.f32 %v4208_v7, %v264_v24  ;;  %v3327_v46 = vpack.c.bf16 %v250_v5, %v243_v4  ;;  %v285_v54 = vand.u32 4294901760, %v4232_v27  ;;  %v272_v56 = vsub.f32 %v4216_v14, %v271_v28 }
  0x5f   :  { %3210 = vmatpush3.bf16.msra.mxu1 %v4124_v36  ;;  %3306 = vmatpush3.bf16.msra.mxu0 %v4124_v36  ;;  %v279_v30 = vsub.f32 %v4221_v15, %v278_v32  ;;  %v292_v38 = vand.u32 4294901760, %v4241_v35  ;;  %v4252_v57 = vsub.f32 %v4128_v39, %v148_v49  ;;  %v3231_v58 = vpack.c.bf16 %v252_v45, %v245_v41 }
  0x60   :  { %3212 = vmatprep.subr.bf16.mxu1 %v4150_v48  ;;  %3308 = vmatprep.subr.bf16.mxu0 %v4150_v48  ;;  %v266_v63 = vand.u32 4294901760, %v265_v37  ;;  %v4257_v1 = vsub.f32 %v4130_v40, %v151_v50  ;;  %v3331_v2 = vpack.c.bf16 %v264_v24, %v257_v20  ;;  %v286_v3 = vsub.f32 %v4232_v27, %v285_v54 }
  0x61   :  { %v273_v39 = vand.u32 4294901760, %v272_v56  ;;  %v280_v49 = vand.u32 4294901760, %v279_v30  ;;  %v293_v4 = vsub.f32 %v4241_v35, %v292_v38  ;;  %v299_v5 = vand.u32 4294901760, %v4252_v57  ;;  %v804_v56 = vld [vmem:[#allocation7 + $0x38] sm:$0xff] }
  0x62   :  { %v306_v40 = vand.u32 4294901760, %v4257_v1  ;;  %v4268_v50 = vsub.f32 %v4138_v44, %v154_v52  ;;  %v4273_v9 = vsub.f32 %v4154_v51, %v157_v55  ;;  %v3335_v11 = vpack.c.bf16 %v278_v32, %v271_v28 }
  0x63   :  { %3214 = vmatpush3.bf16.msra.mxu1 %v4150_v48  ;;  %3310 = vmatpush3.bf16.msra.mxu0 %v4150_v48  ;;  %v294_v16 = vand.u32 4294901760, %v293_v4  ;;  %v300_v18 = vsub.f32 %v4252_v57, %v299_v5  ;;  %v3239_v19 = vpack.c.bf16 %v280_v49, %v273_v39  ;;  %v3339_v51 = vpack.c.bf16 %v292_v38, %v285_v54  ;;  %v805_v38 = vld [vmem:[#allocation7 + $0x40] sm:$0xff] }
  0x64   :  { %3216 = vmatprep.subr.bf16.mxu1 %v4173_v59  ;;  %3312 = vmatprep.subr.bf16.mxu0 %v4173_v59  ;;  %v307_v20 = vsub.f32 %v4257_v1, %v306_v40  ;;  %v313_v44 = vand.u32 4294901760, %v4268_v50  ;;  %v320_v52 = vand.u32 4294901760, %v4273_v9  ;;  %v3343_v32 = vpack.c.bf16 %v306_v40, %v299_v5  ;;  %v809_v4 = vld [vmem:[#allocation7 + $0x60] sm:$0xff]  ;;  %v810_v5 = vld [vmem:[#allocation7 + $0x68] sm:$0xff] }
  0x65   :  { %v301_v55 = vand.u32 4294901760, %v300_v18  ;;  %v3259_v54 = vpack.c.bf16 %v4142_v47, %v4134_v43  ;;  %v860_v40 = vand.u32 4294901760, %v810_v5 }
  0x66   :  { %v3347_v37 = vpack.c.bf16 %v320_v52, %v313_v44 }
  0x67   :  { %3218 = vmatpush3.bf16.msra.mxu1 %v4173_v59  ;;  %3314 = vmatpush3.bf16.msra.mxu0 %v4173_v59 }
  0x68   :  { %3220 = vmatprep.subr.bf16.mxu1 %v4193_v0  ;;  %3316 = vmatprep.subr.bf16.mxu0 %v4193_v0 }
  0x6b   :  { %3222 = vmatpush3.bf16.msra.mxu1 %v4193_v0  ;;  %3318 = vmatpush3.bf16.msra.mxu0 %v4193_v0 }
  0x6c   :  { %3224 = vmatprep.subr.bf16.mxu1 %v3223_v12  ;;  %3320 = vmatprep.subr.bf16.mxu0 %v3319_v8 }
  0x6e   :  { %2594 = vmatmul.mubr.f32.vlgmr.msra.gmra.mrb[0].mxu1 %v206_v31  ;;  %2699 = vmatmul.mubr.f32.vlgmr.msra.gmra.mrb[0].mxu0 %v204_v62  ;;  %v259_v62 = vand.u32 4294901760, %v258_v29  ;;  %v308_v31 = vand.u32 4294901760, %v307_v20 }
  0x6f   :  { %3226 = vmatpush3.bf16.msra.mxu1 %v3223_v12  ;;  %3322 = vmatpush3.bf16.msra.mxu0 %v3319_v8  ;;  %v287_v12 = vand.u32 4294901760, %v286_v3 }
  0x70   :  { %3228 = vmatprep.subr.bf16.mxu1 %v3227_v22  ;;  %3324 = vmatprep.subr.bf16.mxu0 %v3323_v21  ;;  %v3235_v8 = vpack.c.bf16 %v266_v63, %v259_v62  ;;  %v3247_v28 = vpack.c.bf16 %v308_v31, %v301_v55 }
  0x71   :  { %2628 = vmatprep.mubr.f32.mxu1 %v4089_v23  ;;  %2733 = vmatprep.mubr.f32.mxu0 %v4089_v23  ;;  %v3243_v24 = vpack.c.bf16 %v294_v16, %v287_v12  ;;  %v811_v12 = vld [vmem:[#allocation7 + $0x70] sm:$0xff]  ;;  %v812_v16 = vld [vmem:[#allocation7 + $0x78] sm:$0xff] }
  0x72   :  { %v863_v18 = vand.u32 4294901760, %v811_v12 }
  0x73   :  { %3230 = vmatpush3.bf16.msra.mxu1 %v3227_v22  ;;  %3326 = vmatpush3.bf16.msra.mxu0 %v3323_v21  ;;  %v314_v21 = vsub.f32 %v4268_v50, %v313_v44  ;;  %v321_v22 = vsub.f32 %v4273_v9, %v320_v52 }
  0x74   :  { %3232 = vmatprep.subr.bf16.mxu1 %v3231_v58  ;;  %3328 = vmatprep.subr.bf16.mxu0 %v3327_v46 }
  0x75   :  { %v315_v41 = vand.u32 4294901760, %v314_v21  ;;  %v322_v45 = vand.u32 4294901760, %v321_v22 }
  0x77   :  { %3234 = vmatpush3.bf16.msra.mxu1 %v3231_v58  ;;  %3330 = vmatpush3.bf16.msra.mxu0 %v3327_v46  ;;  %v3251_v29 = vpack.c.bf16 %v322_v45, %v315_v41  ;;  %v3255_v46 = vpack.c.bf16 %v4116_v34, %v4114_v33  ;;  %v3263_v33 = vpack.c.bf16 %v4183_v61, %v4178_v60  ;;  %v4316_v60 = vld [vmem:[#allocation7 + $0x18] sm:$0xff]  ;;  %v845_v58 = vand.u32 4294901760, %v805_v38 }
  0x78   :  { %3236 = vmatprep.subr.bf16.mxu1 %v3235_v8  ;;  %3332 = vmatprep.subr.bf16.mxu0 %v3331_v2  ;;  %v3267_v34 = vpack.c.bf16 %v4208_v7, %v4203_v6  ;;  %v830_v6 = vand.u32 4294901760, %v4316_v60 }
  0x7b   :  { %3238 = vmatpush3.bf16.msra.mxu1 %v3235_v8  ;;  %3334 = vmatpush3.bf16.msra.mxu0 %v3331_v2  ;;  %v808_v2 = vld [vmem:[#allocation7 + $0x58] sm:$0xff]  ;;  %v857_v8 = vand.u32 4294901760, %v809_v4 }
  0x7c   :  { %3240 = vmatprep.subr.bf16.mxu1 %v3239_v19  ;;  %3336 = vmatprep.subr.bf16.mxu0 %v3335_v11  ;;  %v854_v39 = vand.u32 4294901760, %v808_v2 }
  0x7f   :  { %3242 = vmatpush3.bf16.msra.mxu1 %v3239_v19  ;;  %3338 = vmatpush3.bf16.msra.mxu0 %v3335_v11  ;;  %v866_v19 = vand.u32 4294901760, %v812_v16 }
  0x80   :  { %3244 = vmatprep.subr.bf16.mxu1 %v3243_v24  ;;  %3340 = vmatprep.subr.bf16.mxu0 %v3339_v51 }
  0x81   :  { %v4363_v52 = vpack.c.bf16 %v866_v19, %v863_v18 }
  0x83   :  { %3246 = vmatpush3.bf16.msra.mxu1 %v3243_v24  ;;  %3342 = vmatpush3.bf16.msra.mxu0 %v3339_v51 }
  0x84   :  { %3248 = vmatprep.subr.bf16.mxu1 %v3247_v28  ;;  %3344 = vmatprep.subr.bf16.mxu0 %v3343_v32 }
  0x87   :  { %3250 = vmatpush3.bf16.msra.mxu1 %v3247_v28  ;;  %3346 = vmatpush3.bf16.msra.mxu0 %v3343_v32 }
  0x88   :  { %3252 = vmatprep.subr.bf16.mxu1 %v3251_v29  ;;  %3348 = vmatprep.subr.bf16.mxu0 %v3347_v37 }
  0x8b   :  { %3254 = vmatpush3.bf16.msra.mxu1 %v3251_v29  ;;  %3350 = vmatpush3.bf16.msra.mxu0 %v3347_v37 }
  0x8c   :  { %3256 = vmatprep.subr.bf16.mxu1 %v3255_v46  ;;  %3352 = vmatprep.subr.bf16.mxu0 %v4061_v10 }
  0x8e   :  { %2629 = vmatmul.mubr.f32.vlgmr.msra.gmra.mrb[0].mxu1 %v4132_v42  ;;  %2734 = vmatmul.mubr.f32.vlgmr.msra.gmra.mrb[0].mxu0 %v4132_v42 }
  0x8f   :  { %3258 = vmatpush3.bf16.msra.mxu1 %v3255_v46  ;;  %3354 = vmatpush3.bf16.msra.mxu0 %v4061_v10  ;;  %v3271_v10 = vpack.c.bf16 %v4221_v15, %v4216_v14 }
  0x90   :  { %3260 = vmatprep.subr.bf16.mxu1 %v3259_v54  ;;  %3356 = vmatprep.subr.bf16.mxu0 %v4065_v13 }
  0x91   :  { %2663 = vmatprep.mubr.f32.mxu1 %v4094_v25  ;;  %2768 = vmatprep.mubr.f32.mxu0 %v4089_v23  ;;  %v797_v23 = vld [vmem:[#allocation7] sm:$0xff]  ;;  %v798_v25 = vld [vmem:[#allocation7 + $0x8] sm:$0xff] }
  0x92   :  { %v821_v43 = vand.u32 4294901760, %v797_v23  ;;  %v824_v47 = vand.u32 4294901760, %v798_v25 }
  0x93   :  { %3262 = vmatpush3.bf16.msra.mxu1 %v3259_v54  ;;  %3358 = vmatpush3.bf16.msra.mxu0 %v4065_v13  ;;  %v3275_v13 = vpack.c.bf16 %v4241_v35, %v4232_v27  ;;  %v803_v35 = vld [vmem:[#allocation7 + $0x30] sm:$0xff] }
  0x94   :  { %3264 = vmatprep.subr.bf16.mxu1 %v3263_v33  ;;  %3360 = vmatprep.subr.bf16.mxu0 %v4081_v17  ;;  %v4320_v61 = vpack.c.bf16 %v824_v47, %v821_v43  ;;  %v839_v30 = vand.u32 4294901760, %v803_v35  ;;  %v4357_v11 = vsub.f32 %v798_v25, %v824_v47 }
  0x96   :  { %v931_v44 = vand.u32 4294901760, %v4357_v11  ;;  %v4388_v37 = vsub.f32 %v803_v35, %v839_v30 }
  0x97   :  { %3266 = vmatpush3.bf16.msra.mxu1 %v3263_v33  ;;  %3362 = vmatpush3.bf16.msra.mxu0 %v4081_v17  ;;  %v3279_v17 = vpack.c.bf16 %v4257_v1, %v4252_v57  ;;  %v806_v57 = vld [vmem:[#allocation7 + $0x48] sm:$0xff]  ;;  %v807_v1 = vld [vmem:[#allocation7 + $0x50] sm:$0xff] }
  0x98   :  { %3268 = vmatprep.subr.bf16.mxu1 %v3267_v34  ;;  %3364 = vmatprep.subr.bf16.mxu0 %v4102_v26  ;;  %v848_v62 = vand.u32 4294901760, %v806_v57  ;;  %v851_v3 = vand.u32 4294901760, %v807_v1  ;;  %v932_v55 = vsub.f32 %v4357_v11, %v931_v44 }
  0x9a   :  { %v4345_v63 = vpack.c.bf16 %v848_v62, %v845_v58  ;;  %v4349_v49 = vpack.c.bf16 %v854_v39, %v851_v3  ;;  %v933_v31 = vand.u32 4294901760, %v932_v55  ;;  %v4401_v25 = vsub.f32 %v806_v57, %v848_v62 }
  0x9b   :  { %3270 = vmatpush3.bf16.msra.mxu1 %v3267_v34  ;;  %3366 = vmatpush3.bf16.msra.mxu0 %v4102_v26  ;;  %v3283_v26 = vpack.c.bf16 %v4273_v9, %v4268_v50  ;;  %v4353_v50 = vpack.c.bf16 %v860_v40, %v857_v8  ;;  %v4355_v9 = vsub.f32 %v797_v23, %v821_v43  ;;  %v966_v34 = vand.u32 4294901760, %v4388_v37 }
  0x9c   :  { %3272 = vmatprep.subr.bf16.mxu1 %v3271_v10  ;;  %3368 = vmatprep.subr.bf16.mxu0 %v4124_v36  ;;  %v4399_v23 = vsub.f32 %v805_v38, %v845_v58  ;;  %v4414_v35 = vsub.f32 %v807_v1, %v851_v3  ;;  %v4432_v3 = vsub.f32 %v810_v5, %v860_v40 }
  0x9d   :  { %v924_v20 = vand.u32 4294901760, %v4355_v9 }
  0x9e   :  { %v980_v47 = vand.u32 4294901760, %v4399_v23  ;;  %v4935_v57 = vand.u32 4294901760, %v4414_v35 }
  0x9f   :  { %3274 = vmatpush3.bf16.msra.mxu1 %v3271_v10  ;;  %3370 = vmatpush3.bf16.msra.mxu0 %v4124_v36  ;;  %v4314_v36 = vld [vmem:[#allocation7 + $0x10] sm:$0xff]  ;;  %v925_v51 = vsub.f32 %v4355_v9, %v924_v20 }
  0xa0   :  { %3276 = vmatprep.subr.bf16.mxu1 %v3275_v13  ;;  %3372 = vmatprep.subr.bf16.mxu0 %v4150_v48 }
  0xa1   :  { %v926_v24 = vand.u32 4294901760, %v925_v51  ;;  %v995_v51 = vsub.f32 %v4414_v35, %v4935_v57 }
  0xa3   :  { %3278 = vmatpush3.bf16.msra.mxu1 %v3275_v13  ;;  %3374 = vmatpush3.bf16.msra.mxu0 %v4150_v48  ;;  %v827_v48 = vand.u32 4294901760, %v4314_v36  ;;  %v4373_v21 = vpack.c.bf16 %v933_v31, %v926_v24  ;;  %v4932_v31 = vand.u32 4294901760, %v4432_v3 }
  0xa4   :  { %3280 = vmatprep.subr.bf16.mxu1 %v3279_v17  ;;  %3376 = vmatprep.subr.bf16.mxu0 %v4173_v59 }
  0xa5   :  { %v4330_v7 = vpack.c.bf16 %v830_v6, %v827_v48 }
  0xa7   :  { %3282 = vmatpush3.bf16.msra.mxu1 %v3279_v17  ;;  %3378 = vmatpush3.bf16.msra.mxu0 %v4173_v59  ;;  %v801_v59 = vld [vmem:[#allocation7 + $0x20] sm:$0xff]  ;;  %v967_v17 = vsub.f32 %v4388_v37, %v966_v34 }
  0xa8   :  { %3284 = vmatprep.subr.bf16.mxu1 %v3283_v26  ;;  %3380 = vmatprep.subr.bf16.mxu0 %v4193_v0  ;;  %v833_v14 = vand.u32 4294901760, %v801_v59 }
  0xa9   :  { %v968_v43 = vand.u32 4294901760, %v967_v17 }
  0xaa   :  { %v4375_v22 = vsub.f32 %v801_v59, %v833_v14  ;;  %v987_v59 = vand.u32 4294901760, %v4401_v25 }
  0xab   :  { %3286 = vmatpush3.bf16.msra.mxu1 %v3283_v26  ;;  %3382 = vmatpush3.bf16.msra.mxu0 %v4193_v0  ;;  %v802_v0 = vld [vmem:[#allocation7 + $0x28] sm:$0xff] }
  0xac   :  { %3384 = vmatprep.subr.bf16.mxu1 %v4320_v61  ;;  %v836_v15 = vand.u32 4294901760, %v802_v0  ;;  %v952_v32 = vand.u32 4294901760, %v4375_v22 }
  0xae   :  { %2664 = vmatmul.mubr.f32.vlgmr.msra.gmra.mrb[0].mxu1 %v4158_v53  ;;  %2769 = vmatmul.mubr.f32.vlgmr.msra.gmra.mrb[0].mxu0 %v4132_v42  ;;  %v4337_v27 = vpack.c.bf16 %v836_v15, %v833_v14  ;;  %v842_v53 = vand.u32 4294901760, %v804_v56  ;;  %v4377_v28 = vsub.f32 %v802_v0, %v836_v15  ;;  %v953_v45 = vsub.f32 %v4375_v22, %v952_v32 }
  0xaf   :  { %3386 = vmatpush3.bf16.msra.mxu1 %v4320_v61  ;;  %v981_v14 = vsub.f32 %v4399_v23, %v980_v47  ;;  %v988_v15 = vsub.f32 %v4401_v25, %v987_v59 }
  0xb0   :  { %3388 = vmatprep.subr.bf16.mxu1 %v4330_v7  ;;  %v4341_v42 = vpack.c.bf16 %v842_v53, %v839_v30  ;;  %v959_v41 = vand.u32 4294901760, %v4377_v28  ;;  %v4390_v46 = vsub.f32 %v804_v56, %v842_v53  ;;  %v954_v54 = vand.u32 4294901760, %v953_v45 }
  0xb1   :  { %v4416_v56 = vsub.f32 %v808_v2, %v854_v39  ;;  %v982_v53 = vand.u32 4294901760, %v981_v14  ;;  %v989_v38 = vand.u32 4294901760, %v988_v15  ;;  %v4430_v2 = vsub.f32 %v809_v4, %v857_v8 }
  0xb2   :  { %v960_v29 = vsub.f32 %v4377_v28, %v959_v41  ;;  %v973_v10 = vand.u32 4294901760, %v4390_v46  ;;  %v996_v39 = vand.u32 4294901760, %v995_v51  ;;  %v1016_v4 = vsub.f32 %v4432_v3, %v4932_v31 }
  0xb3   :  { %3390 = vmatpush3.bf16.msra.mxu1 %v4330_v7  ;;  %v4934_v58 = vand.u32 4294901760, %v4416_v56  ;;  %v4422_v62 = vpack.c.bf16 %v989_v38, %v982_v53  ;;  %v4933_v24 = vand.u32 4294901760, %v4430_v2  ;;  %v4460_v14 = vpack.c.bf16 %v4377_v28, %v4375_v22 }
  0xb4   :  { %3392 = vmatprep.subr.bf16.mxu1 %v4337_v27  ;;  %v961_v33 = vand.u32 4294901760, %v960_v29  ;;  %v974_v26 = vsub.f32 %v4390_v46, %v973_v10  ;;  %v1017_v17 = vand.u32 4294901760, %v1016_v4  ;;  %v4464_v15 = vpack.c.bf16 %v4390_v46, %v4388_v37 }
  0xb5   :  { %v1002_v1 = vsub.f32 %v4416_v56, %v4934_v58  ;;  %v1009_v29 = vsub.f32 %v4430_v2, %v4933_v24  ;;  %v4468_v53 = vpack.c.bf16 %v4401_v25, %v4399_v23  ;;  %v4472_v38 = vpack.c.bf16 %v4416_v56, %v4414_v35  ;;  %v1513_v25 = vld [vmem:[#allocation8 + $0x38] sm:$0xff] }
  0xb6   :  { %v4394_v13 = vpack.c.bf16 %v961_v33, %v954_v54  ;;  %v975_v0 = vand.u32 4294901760, %v974_v26  ;;  %v4441_v54 = vsub.f32 %v811_v12, %v863_v18  ;;  %v4443_v33 = vsub.f32 %v812_v16, %v866_v19 }
  0xb7   :  { %3394 = vmatpush3.bf16.msra.mxu1 %v4337_v27  ;;  %v1003_v55 = vand.u32 4294901760, %v1002_v1  ;;  %v1010_v5 = vand.u32 4294901760, %v1009_v29  ;;  %v4476_v51 = vpack.c.bf16 %v4432_v3, %v4430_v2  ;;  %v4943_v22 = vand.u32 4294901760, %v4416_v56 }
  0xb8   :  { %3396 = vmatprep.subr.bf16.mxu1 %v4341_v42  ;;  %v4418_v30 = vpack.c.bf16 %v975_v0, %v968_v43  ;;  %v4931_v8 = vand.u32 4294901760, %v4441_v54  ;;  %v4930_v40 = vand.u32 4294901760, %v4443_v33  ;;  %v3447_v0 = vpack.c.bf16 %v4357_v11, %v4355_v9 }
  0xb9   :  { %v4436_v45 = vpack.c.bf16 %v1003_v55, %v996_v39  ;;  %v3439_v16 = vpack.c.bf16 %v1017_v17, %v1010_v5  ;;  %v4480_v1 = vpack.c.bf16 %v4443_v33, %v4441_v54  ;;  %v2234_v39 = vld [vmem:[%s4924_s2] ss:$0 sm:$0xff]  ;;  %v3519_v9 = vpack.c.bf16 %v959_v41, %v952_v32 }
  0xba   :  { %v1023_v26 = vsub.f32 %v4441_v54, %v4931_v8  ;;  %v1030_v12 = vsub.f32 %v4443_v33, %v4930_v40  ;;  %v4493_v40 = vsub.f32 %v4316_v60, %v830_v6  ;;  %v3523_v11 = vpack.c.bf16 %v973_v10, %v966_v34 }
  0xbb   :  { %3398 = vmatpush3.bf16.msra.mxu1 %v4341_v42  ;;  %v4944_v32 = vand.u32 4294901760, %v4430_v2  ;;  %v4945_v41 = vand.u32 4294901760, %v4432_v3  ;;  %v4946_v46 = vand.u32 4294901760, %v4441_v54  ;;  %v4947_v34 = vand.u32 4294901760, %v4443_v33  ;;  %v1516_v3 = vld [vmem:[#allocation8 + $0x50] sm:$0xff]  ;;  %v1517_v54 = vld [vmem:[#allocation8 + $0x58] sm:$0xff] }
  0xbc   :  { %3400 = vmatprep.subr.bf16.mxu1 %v4345_v63  ;;  %v1024_v18 = vand.u32 4294901760, %v1023_v26  ;;  %v1031_v19 = vand.u32 4294901760, %v1030_v12  ;;  %v1560_v33 = vand.u32 4294901760, %v1516_v3 }
  0xbd   :  { %v3535_v37 = vpack.c.bf16 %v4945_v41, %v4944_v32  ;;  %v3539_v10 = vpack.c.bf16 %v4947_v34, %v4946_v46 }
  0xbe   :  { %v3443_v43 = vpack.c.bf16 %v1031_v19, %v1024_v18  ;;  %v4488_v19 = vsub.f32 %v4314_v36, %v827_v48 }
  0xbf   :  { %3402 = vmatpush3.bf16.msra.mxu1 %v4345_v63 }
  0xc0   :  { %3404 = vmatprep.subr.bf16.mxu1 %v4349_v49  ;;  %v938_v8 = vand.u32 4294901760, %v4488_v19 }
  0xc2   :  { %v939_v36 = vsub.f32 %v4488_v19, %v938_v8 }
  0xc3   :  { %3406 = vmatpush3.bf16.msra.mxu1 %v4349_v49 }
  0xc4   :  { %3408 = vmatprep.subr.bf16.mxu1 %v4353_v50 }
  0xc7   :  { %3410 = vmatpush3.bf16.msra.mxu1 %v4353_v50 }
  0xc8   :  { %3412 = vmatprep.subr.bf16.mxu1 %v4363_v52 }
  0xcb   :  { %3414 = vmatpush3.bf16.msra.mxu1 %v4363_v52 }
  0xcc   :  { %3416 = vmatprep.subr.bf16.mxu1 %v4373_v21 }
 0x181   :  { %v2665_v55 = vpop.f32.mrb[0].mxu1  ;;  %v2770_v29 = vpop.f32.mrb[0].mxu0 }
 0x182   :  { %v3767_v4 = vadd.f32 %v2665_v55, %v2234_v39  ;;  %v469_v5 = vpop.f32.mrb[1].mxu1  ;;  %v785_v17 = vpop.f32.mrb[1].mxu0  ;;  %v945_v55 = vand.u32 4294901760, %v4493_v40 }
 0x183   :  { %v3769_v26 = vadd.f32 %v2234_v39, %v469_v5 }
 0x184   :  { %v3768_v12 = vadd.f32 %v3767_v4, %v2770_v29  ;;  %v946_v60 = vsub.f32 %v4493_v40, %v945_v55 }
 0x185   :  { %v3770_v18 = vadd.f32 %v3769_v26, %v785_v17  ;;  %v940_v26 = vand.u32 4294901760, %v939_v36 }
 0x186   :  { %3810 = vtanh.f32 %v3768_v12  ;;  %v947_v12 = vand.u32 4294901760, %v946_v60 }
 0x187   :  { %3812 = vtanh.f32 %v3770_v18 }
 0x188   :  { %v3419_v57 = vpack.c.bf16 %v947_v12, %v940_v26 }
 0x190   :  { %v3811_v31 = vpop.eup %3810 }
 0x191   :  { %v3813_v39 = vpop.eup %3812  ;;  %v4497_v29 = vand.u32 4294901760, %v3811_v31 }
 0x192   :  { %v4499_v4 = vand.u32 4294901760, %v3813_v39 }
 0x193   :  { %v4502_v5 = vsub.f32 %v3811_v31, %v4497_v29 }
 0x194   :  { %v4511_v48 = vsub.f32 %v3813_v39, %v4499_v4 }
 0x195   :  { %v913_v6 = vand.u32 4294901760, %v4502_v5 }
 0x196   :  { %v903_v17 = vand.u32 4294901760, %v4511_v48 }
 0x197   :  { %v914_v31 = vsub.f32 %v4502_v5, %v913_v6 }
 0x198   :  { %v904_v18 = vsub.f32 %v4511_v48, %v903_v17 }
 0x199   :  { %v915_v58 = vand.u32 4294901760, %v914_v31 }
 0x19a   :  { %v905_v24 = vand.u32 4294901760, %v904_v18 }
 0x19c   :  { %2803 = vmatprep.mubr.f32.mxu1 %v905_v24  ;;  %v4541_v24 = vld [vmem:[#allocation8 + $0x18] sm:$0xff] }
 0x19d   :  { %2804 = vmatmul.mubr.f32.vlgmr.msra.gmra.mrb[2].mxu1 %v915_v58 }
 0x19e   :  { %3418 = vmatpush3.bf16.msra.mxu1 %v4373_v21  ;;  %2838 = vmatprep.mubr.f32.mxu1 %v4499_v4  ;;  %v3451_v21 = vpack.c.bf16 %v4493_v40, %v4488_v19 }
 0x19f   :  { %3420 = vmatprep.subr.bf16.mxu1 %v3419_v57 }
 0x1a2   :  { %3422 = vmatpush3.bf16.msra.mxu1 %v3419_v57  ;;  %v4536_v57 = vld [vmem:[#allocation8 + $0x10] sm:$0xff] }
 0x1a3   :  { %3424 = vmatprep.subr.bf16.mxu1 %v4394_v13 }
 0x1a6   :  { %3426 = vmatpush3.bf16.msra.mxu1 %v4394_v13  ;;  %v4532_v13 = vld [vmem:[#allocation8] sm:$0xff] }
 0x1a7   :  { %3428 = vmatprep.subr.bf16.mxu1 %v4418_v30  ;;  %v1530_v58 = vand.u32 4294901760, %v4532_v13 }
 0x1aa   :  { %3430 = vmatpush3.bf16.msra.mxu1 %v4418_v30  ;;  %v4534_v30 = vld [vmem:[#allocation8 + $0x8] sm:$0xff] }
 0x1ab   :  { %3432 = vmatprep.subr.bf16.mxu1 %v4422_v62 }
 0x1ae   :  { %3434 = vmatpush3.bf16.msra.mxu1 %v4422_v62  ;;  %v1533_v62 = vand.u32 4294901760, %v4534_v30 }
 0x1af   :  { %3436 = vmatprep.subr.bf16.mxu1 %v4436_v45 }
 0x1b0   :  { %v4670_v39 = vsub.f32 %v4534_v30, %v1533_v62 }
 0x1b2   :  { %3438 = vmatpush3.bf16.msra.mxu1 %v4436_v45  ;;  %v1536_v45 = vand.u32 4294901760, %v4536_v57 }
 0x1b3   :  { %3440 = vmatprep.subr.bf16.mxu1 %v3439_v16 }
 0x1b6   :  { %3442 = vmatpush3.bf16.msra.mxu1 %v3439_v16  ;;  %v1539_v16 = vand.u32 4294901760, %v4541_v24 }
 0x1b7   :  { %3444 = vmatprep.subr.bf16.mxu1 %v3443_v43 }
 0x1ba   :  { %3446 = vmatpush3.bf16.msra.mxu1 %v3443_v43  ;;  %v4549_v43 = vpack.c.bf16 %v1533_v62, %v1530_v58 }
 0x1bb   :  { %3448 = vmatprep.subr.bf16.mxu1 %v3447_v0 }
 0x1bc   :  { %3576 = vmatprep.subr.bf16.mxu0 %v4549_v43 }
 0x1bd   :  { %2839 = vmatmul.mubr.f32.vlgmr.msra.gmra.mrb[2].mxu1 %v4497_v29  ;;  %3578 = vmatpush3.bf16.msra.mxu0 %v4549_v43 }
 0x1be   :  { %3450 = vmatpush3.bf16.msra.mxu1 %v3447_v0  ;;  %2873 = vmatprep.mubr.f32.mxu1 %v4511_v48  ;;  %v4555_v0 = vpack.c.bf16 %v1539_v16, %v1536_v45  ;;  %v1640_v48 = vand.u32 4294901760, %v4670_v39 }
 0x1bf   :  { %3452 = vmatprep.subr.bf16.mxu1 %v3451_v21 }
 0x1c0   :  { %3580 = vmatprep.subr.bf16.mxu0 %v4555_v0  ;;  %v1641_v31 = vsub.f32 %v4670_v39, %v1640_v48 }
 0x1c1   :  { %3582 = vmatpush3.bf16.msra.mxu0 %v4555_v0 }
 0x1c2   :  { %3454 = vmatpush3.bf16.msra.mxu1 %v3451_v21  ;;  %v1642_v12 = vand.u32 4294901760, %v1641_v31 }
 0x1c3   :  { %3456 = vmatprep.subr.bf16.mxu1 %v4460_v14 }
 0x1c6   :  { %3458 = vmatpush3.bf16.msra.mxu1 %v4460_v14  ;;  %v3511_v14 = vpack.c.bf16 %v931_v44, %v924_v20  ;;  %v3527_v20 = vpack.c.bf16 %v987_v59, %v980_v47  ;;  %v4942_v44 = vand.u32 4294901760, %v4414_v35  ;;  %v1551_v47 = vand.u32 4294901760, %v1513_v25  ;;  %v1514_v59 = vld [vmem:[#allocation8 + $0x40] sm:$0xff] }
 0x1c7   :  { %3460 = vmatprep.subr.bf16.mxu1 %v4464_v15  ;;  %v1554_v35 = vand.u32 4294901760, %v1514_v59 }
 0x1c8   :  { %v3531_v28 = vpack.c.bf16 %v4943_v22, %v4942_v44 }
 0x1c9   :  { %v4712_v41 = vsub.f32 %v1514_v59, %v1554_v35 }
 0x1ca   :  { %3462 = vmatpush3.bf16.msra.mxu1 %v4464_v15  ;;  %v3515_v15 = vpack.c.bf16 %v945_v55, %v938_v8  ;;  %v1563_v8 = vand.u32 4294901760, %v1517_v54  ;;  %v4665_v55 = vsub.f32 %v4532_v13, %v1530_v58 }
 0x1cb   :  { %3464 = vmatprep.subr.bf16.mxu1 %v4468_v53 }
 0x1cc   :  { %v4656_v40 = vpack.c.bf16 %v1563_v8, %v1560_v33  ;;  %v1633_v60 = vand.u32 4294901760, %v4665_v55 }
 0x1ce   :  { %3466 = vmatpush3.bf16.msra.mxu1 %v4468_v53  ;;  %v1518_v53 = vld [vmem:[#allocation8 + $0x60] sm:$0xff] }
 0x1cf   :  { %3468 = vmatprep.subr.bf16.mxu1 %v4472_v38 }
 0x1d2   :  { %3470 = vmatpush3.bf16.msra.mxu1 %v4472_v38  ;;  %v1519_v38 = vld [vmem:[#allocation8 + $0x68] sm:$0xff] }
 0x1d3   :  { %3472 = vmatprep.subr.bf16.mxu1 %v4476_v51 }
 0x1d6   :  { %3474 = vmatpush3.bf16.msra.mxu1 %v4476_v51  ;;  %v1566_v51 = vand.u32 4294901760, %v1518_v53 }
 0x1d7   :  { %3476 = vmatprep.subr.bf16.mxu1 %v4480_v1 }
 0x1da   :  { %3478 = vmatpush3.bf16.msra.mxu1 %v4480_v1  ;;  %v1569_v1 = vand.u32 4294901760, %v1519_v38 }
 0x1db   :  { %3480 = vmatprep.subr.bf16.mxu1 %v4320_v61 }
 0x1dc   :  { %v4660_v19 = vpack.c.bf16 %v1569_v1, %v1566_v51 }
 0x1dd   :  { %2874 = vmatmul.mubr.f32.vlgmr.msra.gmra.mrb[2].mxu1 %v4502_v5 }
 0x1de   :  { %3482 = vmatpush3.bf16.msra.mxu1 %v4320_v61  ;;  %2908 = vmatprep.mubr.f32.mxu1 %v903_v17  ;;  %v1634_v17 = vsub.f32 %v4665_v55, %v1633_v60 }
 0x1df   :  { %3484 = vmatprep.subr.bf16.mxu1 %v4330_v7 }
 0x1e0   :  { %v1635_v26 = vand.u32 4294901760, %v1634_v17 }
 0x1e2   :  { %3486 = vmatpush3.bf16.msra.mxu1 %v4330_v7  ;;  %v4686_v18 = vpack.c.bf16 %v1642_v12, %v1635_v26 }
 0x1e3   :  { %3488 = vmatprep.subr.bf16.mxu1 %v4337_v27 }
 0x1e6   :  { %3490 = vmatpush3.bf16.msra.mxu1 %v4337_v27 }
 0x1e7   :  { %3492 = vmatprep.subr.bf16.mxu1 %v4341_v42 }
 0x1ea   :  { %3494 = vmatpush3.bf16.msra.mxu1 %v4341_v42 }
 0x1eb   :  { %3496 = vmatprep.subr.bf16.mxu1 %v4345_v63 }
 0x1ee   :  { %3498 = vmatpush3.bf16.msra.mxu1 %v4345_v63 }
 0x1ef   :  { %3500 = vmatprep.subr.bf16.mxu1 %v4349_v49 }
 0x1f2   :  { %3502 = vmatpush3.bf16.msra.mxu1 %v4349_v49 }
 0x1f3   :  { %3504 = vmatprep.subr.bf16.mxu1 %v4353_v50 }
 0x1f6   :  { %3506 = vmatpush3.bf16.msra.mxu1 %v4353_v50 }
 0x1f7   :  { %3508 = vmatprep.subr.bf16.mxu1 %v4363_v52 }
 0x1fa   :  { %3510 = vmatpush3.bf16.msra.mxu1 %v4363_v52 }
 0x1fb   :  { %3512 = vmatprep.subr.bf16.mxu1 %v3511_v14 }
 0x1fd   :  { %2909 = vmatmul.mubr.f32.vlgmr.msra.gmra.mrb[2].mxu1 %v913_v6 }
 0x1fe   :  { %3514 = vmatpush3.bf16.msra.mxu1 %v3511_v14  ;;  %2943 = vmatprep.mubr.f32.mxu1 %v4499_v4 }
 0x1ff   :  { %3516 = vmatprep.subr.bf16.mxu1 %v3515_v15 }
 0x202   :  { %3518 = vmatpush3.bf16.msra.mxu1 %v3515_v15 }
 0x203   :  { %3520 = vmatprep.subr.bf16.mxu1 %v3519_v9 }
 0x206   :  { %3522 = vmatpush3.bf16.msra.mxu1 %v3519_v9  ;;  %v4703_v9 = vsub.f32 %v1513_v25, %v1551_v47  ;;  %v4729_v25 = vsub.f32 %v1517_v54, %v1563_v8  ;;  %v4743_v54 = vsub.f32 %v1518_v53, %v1566_v51 }
 0x207   :  { %3524 = vmatprep.subr.bf16.mxu1 %v3523_v11 }
 0x208   :  { %v1682_v22 = vand.u32 4294901760, %v4703_v9  ;;  %v4939_v26 = vand.u32 4294901760, %v4743_v54 }
 0x20a   :  { %3526 = vmatpush3.bf16.msra.mxu1 %v3523_v11  ;;  %v1683_v46 = vsub.f32 %v4703_v9, %v1682_v22 }
 0x20b   :  { %3528 = vmatprep.subr.bf16.mxu1 %v3527_v20 }
 0x20e   :  { %3530 = vmatpush3.bf16.msra.mxu1 %v3527_v20 }
 0x20f   :  { %3532 = vmatprep.subr.bf16.mxu1 %v3531_v28 }
 0x212   :  { %3534 = vmatpush3.bf16.msra.mxu1 %v3531_v28 }
 0x213   :  { %3536 = vmatprep.subr.bf16.mxu1 %v3535_v37 }
 0x216   :  { %3538 = vmatpush3.bf16.msra.mxu1 %v3535_v37 }
 0x217   :  { %3540 = vmatprep.subr.bf16.mxu1 %v3539_v10 }
 0x21a   :  { %3542 = vmatpush3.bf16.msra.mxu1 %v3539_v10  ;;  %v1689_v10 = vand.u32 4294901760, %v4712_v41 }
 0x21b   :  { %3544 = vmatprep.subr.bf16.mxu1 %v4320_v61 }
 0x21d   :  { %2944 = vmatmul.mubr.f32.vlgmr.msra.gmra.mrb[2].mxu1 %v4497_v29 }
 0x21e   :  { %3546 = vmatpush3.bf16.msra.mxu1 %v4320_v61  ;;  %2978 = vmatprep.mubr.f32.mxu1 %v4499_v4  ;;  %v1510_v61 = vld [vmem:[#allocation8 + $0x20] sm:$0xff]  ;;  %v1521_v4 = vld [vmem:[#allocation8 + $0x78] sm:$0xff] }
 0x21f   :  { %3548 = vmatprep.subr.bf16.mxu1 %v4330_v7  ;;  %v1575_v36 = vand.u32 4294901760, %v1521_v4 }
 0x222   :  { %3550 = vmatpush3.bf16.msra.mxu1 %v4330_v7  ;;  %v1511_v7 = vld [vmem:[#allocation8 + $0x28] sm:$0xff] }
 0x223   :  { %3552 = vmatprep.subr.bf16.mxu1 %v4337_v27 }
 0x226   :  { %3554 = vmatpush3.bf16.msra.mxu1 %v4337_v27  ;;  %v1542_v27 = vand.u32 4294901760, %v1510_v61 }
 0x227   :  { %3556 = vmatprep.subr.bf16.mxu1 %v4341_v42 }
 0x228   :  { %v4688_v21 = vsub.f32 %v1510_v61, %v1542_v27 }
 0x22a   :  { %3558 = vmatpush3.bf16.msra.mxu1 %v4341_v42  ;;  %v1545_v42 = vand.u32 4294901760, %v1511_v7  ;;  %v1661_v30 = vand.u32 4294901760, %v4688_v21 }
 0x22b   :  { %3560 = vmatprep.subr.bf16.mxu1 %v4345_v63 }
 0x22c   :  { %v4644_v23 = vpack.c.bf16 %v1545_v42, %v1542_v27  ;;  %v4690_v13 = vsub.f32 %v1511_v7, %v1545_v42  ;;  %v1662_v62 = vsub.f32 %v4688_v21, %v1661_v30  ;;  %v1684_v7 = vand.u32 4294901760, %v1683_v46 }
 0x22d   :  { %v1690_v27 = vsub.f32 %v4712_v41, %v1689_v10 }
 0x22e   :  { %3562 = vmatpush3.bf16.msra.mxu1 %v4345_v63  ;;  %v1512_v63 = vld [vmem:[#allocation8 + $0x30] sm:$0xff]  ;;  %3584 = vmatprep.subr.bf16.mxu0 %v4644_v23  ;;  %v1668_v58 = vand.u32 4294901760, %v4690_v13  ;;  %v1663_v11 = vand.u32 4294901760, %v1662_v62 }
 0x22f   :  { %3564 = vmatprep.subr.bf16.mxu1 %v4349_v49  ;;  %3586 = vmatpush3.bf16.msra.mxu0 %v4644_v23 }
 0x230   :  { %v1669_v14 = vsub.f32 %v4690_v13, %v1668_v58 }
 0x232   :  { %3566 = vmatpush3.bf16.msra.mxu1 %v4349_v49  ;;  %v1548_v49 = vand.u32 4294901760, %v1512_v63  ;;  %v1670_v20 = vand.u32 4294901760, %v1669_v14  ;;  %v1718_v14 = vsub.f32 %v4743_v54, %v4939_v26 }
 0x233   :  { %3568 = vmatprep.subr.bf16.mxu1 %v4353_v50 }
 0x234   :  { %v4701_v15 = vsub.f32 %v1512_v63, %v1548_v49  ;;  %v4707_v28 = vpack.c.bf16 %v1670_v20, %v1663_v11  ;;  %v4727_v63 = vsub.f32 %v1516_v3, %v1560_v33  ;;  %v4745_v33 = vsub.f32 %v1519_v38, %v1569_v1 }
 0x235   :  { %v4754_v20 = vsub.f32 %v1521_v4, %v1575_v36  ;;  %v1719_v38 = vand.u32 4294901760, %v1718_v14 }
 0x236   :  { %3570 = vmatpush3.bf16.msra.mxu1 %v4353_v50  ;;  %v4648_v50 = vpack.c.bf16 %v1551_v47, %v1548_v49  ;;  %v1675_v44 = vand.u32 4294901760, %v4701_v15  ;;  %v1691_v47 = vand.u32 4294901760, %v1690_v27  ;;  %v4938_v12 = vand.u32 4294901760, %v4745_v33 }
 0x237   :  { %3572 = vmatprep.subr.bf16.mxu1 %v4363_v52  ;;  %v4936_v1 = vand.u32 4294901760, %v4754_v20  ;;  %v3647_v27 = vpack.c.bf16 %v4690_v13, %v4688_v21  ;;  %v4949_v21 = vand.u32 4294901760, %v4729_v25 }
 0x238   :  { %3588 = vmatprep.subr.bf16.mxu0 %v4648_v50  ;;  %v1676_v32 = vsub.f32 %v4701_v15, %v1675_v44  ;;  %v1725_v53 = vsub.f32 %v4745_v33, %v4938_v12 }
 0x239   :  { %3590 = vmatpush3.bf16.msra.mxu0 %v4648_v50 }
 0x23a   :  { %3574 = vmatpush3.bf16.msra.mxu1 %v4363_v52  ;;  %v1515_v52 = vld [vmem:[#allocation8 + $0x48] sm:$0xff]  ;;  %v1677_v34 = vand.u32 4294901760, %v1676_v32  ;;  %v1726_v32 = vand.u32 4294901760, %v1725_v53 }
 0x23b   :  { %v1557_v56 = vand.u32 4294901760, %v1515_v52 }
 0x23c   :  { %v4731_v49 = vpack.c.bf16 %v1684_v7, %v1677_v34  ;;  %v3631_v4 = vpack.c.bf16 %v1726_v32, %v1719_v38  ;;  %v3639_v7 = vpack.c.bf16 %v4670_v39, %v4665_v55  ;;  %v4791_v32 = vsub.f32 %v4536_v57, %v1536_v45 }
 0x23d   :  { %2979 = vmatmul.mubr.f32.vlgmr.msra.gmra.mrb[2].mxu1 %v4497_v29  ;;  %v4652_v2 = vpack.c.bf16 %v1557_v56, %v1554_v35  ;;  %v1520_v29 = vld [vmem:[#allocation8 + $0x70] sm:$0xff]  ;;  %v4714_v37 = vsub.f32 %v1515_v52, %v1557_v56  ;;  %v4941_v52 = vand.u32 4294901760, %v4727_v63  ;;  %v4940_v35 = vand.u32 4294901760, %v4729_v25 }
 0x23e   :  { %v1572_v5 = vand.u32 4294901760, %v1520_v29  ;;  %v3711_v55 = vpack.c.bf16 %v1668_v58, %v1661_v30  ;;  %v3715_v39 = vpack.c.bf16 %v1682_v22, %v1675_v44  ;;  %v4950_v30 = vand.u32 4294901760, %v4743_v54 }
 0x23f   :  { %3592 = vmatprep.subr.bf16.mxu0 %v4652_v2  ;;  %v1696_v61 = vand.u32 4294901760, %v4714_v37  ;;  %v1704_v17 = vsub.f32 %v4727_v63, %v4941_v52  ;;  %v1711_v3 = vsub.f32 %v4729_v25, %v4940_v35  ;;  %v4951_v58 = vand.u32 4294901760, %v4745_v33 }
 0x240   :  { %3594 = vmatpush3.bf16.msra.mxu0 %v4652_v2  ;;  %v4676_v6 = vpack.c.bf16 %v1575_v36, %v1572_v5  ;;  %v4752_v11 = vsub.f32 %v1520_v29, %v1572_v5  ;;  %v1739_v29 = vsub.f32 %v4754_v20, %v4936_v1  ;;  %v4953_v44 = vand.u32 4294901760, %v4754_v20 }
 0x241   :  { %3596 = vmatprep.subr.bf16.mxu0 %v4656_v40  ;;  %v1697_v42 = vsub.f32 %v4714_v37, %v1696_v61  ;;  %v1705_v8 = vand.u32 4294901760, %v1704_v17  ;;  %v1712_v31 = vand.u32 4294901760, %v1711_v3  ;;  %v4779_v17 = vpack.c.bf16 %v4745_v33, %v4743_v54 }
 0x242   :  { %v4937_v51 = vand.u32 4294901760, %v4752_v11  ;;  %v1740_v36 = vand.u32 4294901760, %v1739_v29  ;;  %v4783_v3 = vpack.c.bf16 %v4754_v20, %v4752_v11  ;;  %v1647_v29 = vand.u32 4294901760, %v4791_v32 }
 0x243   :  { %v1698_v59 = vand.u32 4294901760, %v1697_v42  ;;  %v3627_v62 = vpack.c.bf16 %v1712_v31, %v1705_v8  ;;  %v3651_v42 = vpack.c.bf16 %v4703_v9, %v4701_v15  ;;  %v2235_v8 = vld [vmem:[%s4926_s4] ss:$0 sm:$0xff]  ;;  %v3727_v15 = vpack.c.bf16 %v4951_v58, %v4950_v30 }
 0x244   :  { %3598 = vmatpush3.bf16.msra.mxu0 %v4656_v40  ;;  %v1732_v46 = vsub.f32 %v4752_v11, %v4937_v51  ;;  %v1648_v57 = vsub.f32 %v4791_v32, %v1647_v29  ;;  %v4952_v9 = vand.u32 4294901760, %v4752_v11 }
 0x245   :  { %3600 = vmatprep.subr.bf16.mxu0 %v4660_v19  ;;  %v4735_v56 = vpack.c.bf16 %v1698_v59, %v1691_v47  ;;  %v3655_v47 = vpack.c.bf16 %v4714_v37, %v4712_v41  ;;  %v3659_v59 = vpack.c.bf16 %v4729_v25, %v4727_v63 }
 0x246   :  { %v1733_v5 = vand.u32 4294901760, %v1732_v46  ;;  %v4796_v46 = vsub.f32 %v4541_v24, %v1539_v16  ;;  %v1649_v51 = vand.u32 4294901760, %v1648_v57  ;;  %v3731_v22 = vpack.c.bf16 %v4953_v44, %v4952_v9 }
 0x248   :  { %3602 = vmatpush3.bf16.msra.mxu0 %v4660_v19  ;;  %v3635_v34 = vpack.c.bf16 %v1740_v36, %v1733_v5  ;;  %v1654_v5 = vand.u32 4294901760, %v4796_v46 }
 0x249   :  { %3604 = vmatprep.subr.bf16.mxu0 %v4676_v6 }
 0x24a   :  { %v1655_v24 = vsub.f32 %v4796_v46, %v1654_v5 }
 0x24c   :  { %3606 = vmatpush3.bf16.msra.mxu0 %v4676_v6 }
 0x24d   :  { %3608 = vmatprep.subr.bf16.mxu0 %v4686_v18 }
 0x310   :  { %v2980_v31 = vpop.f32.mrb[2].mxu1 }
 0x311   :  { %v3771_v14 = vadd.f32 %v2980_v31, %v2235_v8  ;;  %v1494_v53 = vpop.f32.mrb[3].mxu1 }
 0x312   :  { %v3772_v38 = vadd.f32 %v2235_v8, %v1494_v53 }
 0x313   :  { %3814 = vtanh.f32 %v3771_v14 }
 0x314   :  { %3816 = vtanh.f32 %v3772_v38 }
 0x31d   :  { %v3815_v36 = vpop.eup %3814 }
 0x31e   :  { %v3817_v31 = vpop.eup %3816  ;;  %v4800_v1 = vand.u32 4294901760, %v3815_v36 }
 0x31f   :  { %v4802_v8 = vand.u32 4294901760, %v3817_v31 }
 0x320   :  { %v4805_v14 = vsub.f32 %v3815_v36, %v4800_v1  ;;  %v1656_v36 = vand.u32 4294901760, %v1655_v24 }
 0x321   :  { %v1611_v45 = vsub.f32 %v3817_v31, %v4802_v8 }
 0x322   :  { %v1622_v16 = vand.u32 4294901760, %v4805_v14  ;;  %v3611_v52 = vpack.c.bf16 %v1656_v36, %v1649_v51 }
 0x323   :  { %v1612_v53 = vand.u32 4294901760, %v1611_v45 }
 0x324   :  { %v1623_v38 = vsub.f32 %v4805_v14, %v1622_v16 }
 0x325   :  { %v1613_v12 = vsub.f32 %v1611_v45, %v1612_v53 }
 0x326   :  { %v1624_v35 = vand.u32 4294901760, %v1623_v38 }
 0x327   :  { %v1614_v26 = vand.u32 4294901760, %v1613_v12 }
 0x329   :  { %3013 = vmatprep.mubr.f32.mxu0 %v1614_v26 }
 0x32a   :  { %3014 = vmatmul.mubr.f32.vlgmr.msra.gmra.mrb[2].mxu0 %v1624_v35 }
 0x32b   :  { %3610 = vmatpush3.bf16.msra.mxu0 %v4686_v18  ;;  %3048 = vmatprep.mubr.f32.mxu0 %v4802_v8  ;;  %v3643_v18 = vpack.c.bf16 %v4796_v46, %v4791_v32 }
 0x32c   :  { %3612 = vmatprep.subr.bf16.mxu0 %v3611_v52 }
 0x32f   :  { %3614 = vmatpush3.bf16.msra.mxu0 %v3611_v52 }
 0x330   :  { %3616 = vmatprep.subr.bf16.mxu0 %v4707_v28 }
 0x333   :  { %3618 = vmatpush3.bf16.msra.mxu0 %v4707_v28  ;;  %v3703_v28 = vpack.c.bf16 %v1640_v48, %v1633_v60  ;;  %v3719_v60 = vpack.c.bf16 %v1696_v61, %v1689_v10  ;;  %v4948_v48 = vand.u32 4294901760, %v4727_v63 }
 0x334   :  { %3620 = vmatprep.subr.bf16.mxu0 %v4731_v49 }
 0x335   :  { %v3723_v13 = vpack.c.bf16 %v4949_v21, %v4948_v48 }
 0x337   :  { %3622 = vmatpush3.bf16.msra.mxu0 %v4731_v49  ;;  %v3707_v49 = vpack.c.bf16 %v1654_v5, %v1647_v29 }
 0x338   :  { %3624 = vmatprep.subr.bf16.mxu0 %v4735_v56 }
 0x33b   :  { %3626 = vmatpush3.bf16.msra.mxu0 %v4735_v56 }
 0x33c   :  { %3628 = vmatprep.subr.bf16.mxu0 %v3627_v62 }
 0x33f   :  { %3630 = vmatpush3.bf16.msra.mxu0 %v3627_v62 }
 0x340   :  { %3632 = vmatprep.subr.bf16.mxu0 %v3631_v4 }
 0x343   :  { %3634 = vmatpush3.bf16.msra.mxu0 %v3631_v4 }
 0x344   :  { %3636 = vmatprep.subr.bf16.mxu0 %v3635_v34 }
 0x347   :  { %3638 = vmatpush3.bf16.msra.mxu0 %v3635_v34 }
 0x348   :  { %3640 = vmatprep.subr.bf16.mxu0 %v3639_v7 }
 0x34a   :  { %3049 = vmatmul.mubr.f32.vlgmr.msra.gmra.mrb[2].mxu0 %v4800_v1 }
 0x34b   :  { %3642 = vmatpush3.bf16.msra.mxu0 %v3639_v7  ;;  %3083 = vmatprep.mubr.f32.mxu0 %v1611_v45 }
 0x34c   :  { %3644 = vmatprep.subr.bf16.mxu0 %v3643_v18 }
 0x34f   :  { %3646 = vmatpush3.bf16.msra.mxu0 %v3643_v18 }
 0x350   :  { %3648 = vmatprep.subr.bf16.mxu0 %v3647_v27 }
 0x353   :  { %3650 = vmatpush3.bf16.msra.mxu0 %v3647_v27 }
 0x354   :  { %3652 = vmatprep.subr.bf16.mxu0 %v3651_v42 }
 0x357   :  { %3654 = vmatpush3.bf16.msra.mxu0 %v3651_v42 }
 0x358   :  { %3656 = vmatprep.subr.bf16.mxu0 %v3655_v47 }
 0x35b   :  { %3658 = vmatpush3.bf16.msra.mxu0 %v3655_v47 }
 0x35c   :  { %3660 = vmatprep.subr.bf16.mxu0 %v3659_v59 }
 0x35f   :  { %3662 = vmatpush3.bf16.msra.mxu0 %v3659_v59 }
 0x360   :  { %3664 = vmatprep.subr.bf16.mxu0 %v4779_v17 }
 0x363   :  { %3666 = vmatpush3.bf16.msra.mxu0 %v4779_v17 }
 0x364   :  { %3668 = vmatprep.subr.bf16.mxu0 %v4783_v3 }
 0x367   :  { %3670 = vmatpush3.bf16.msra.mxu0 %v4783_v3 }
 0x368   :  { %3672 = vmatprep.subr.bf16.mxu0 %v4549_v43 }
 0x36a   :  { %3084 = vmatmul.mubr.f32.vlgmr.msra.gmra.mrb[2].mxu0 %v4805_v14 }
 0x36b   :  { %3674 = vmatpush3.bf16.msra.mxu0 %v4549_v43  ;;  %3118 = vmatprep.mubr.f32.mxu0 %v1612_v53 }
 0x36c   :  { %3676 = vmatprep.subr.bf16.mxu0 %v4555_v0 }
 0x36f   :  { %3678 = vmatpush3.bf16.msra.mxu0 %v4555_v0 }
 0x370   :  { %3680 = vmatprep.subr.bf16.mxu0 %v4644_v23 }
 0x373   :  { %3682 = vmatpush3.bf16.msra.mxu0 %v4644_v23 }
 0x374   :  { %3684 = vmatprep.subr.bf16.mxu0 %v4648_v50 }
 0x377   :  { %3686 = vmatpush3.bf16.msra.mxu0 %v4648_v50 }
 0x378   :  { %3688 = vmatprep.subr.bf16.mxu0 %v4652_v2 }
 0x37b   :  { %3690 = vmatpush3.bf16.msra.mxu0 %v4652_v2 }
 0x37c   :  { %3692 = vmatprep.subr.bf16.mxu0 %v4656_v40 }
 0x37f   :  { %3694 = vmatpush3.bf16.msra.mxu0 %v4656_v40 }
 0x380   :  { %3696 = vmatprep.subr.bf16.mxu0 %v4660_v19 }
 0x383   :  { %3698 = vmatpush3.bf16.msra.mxu0 %v4660_v19 }
 0x384   :  { %3700 = vmatprep.subr.bf16.mxu0 %v4676_v6 }
 0x387   :  { %3702 = vmatpush3.bf16.msra.mxu0 %v4676_v6 }
 0x388   :  { %3704 = vmatprep.subr.bf16.mxu0 %v3703_v28 }
 0x38a   :  { %3119 = vmatmul.mubr.f32.vlgmr.msra.gmra.mrb[2].mxu0 %v1622_v16 }
 0x38b   :  { %3706 = vmatpush3.bf16.msra.mxu0 %v3703_v28  ;;  %3153 = vmatprep.mubr.f32.mxu0 %v4802_v8 }
 0x38c   :  { %3708 = vmatprep.subr.bf16.mxu0 %v3707_v49 }
 0x38f   :  { %3710 = vmatpush3.bf16.msra.mxu0 %v3707_v49 }
 0x390   :  { %3712 = vmatprep.subr.bf16.mxu0 %v3711_v55 }
 0x393   :  { %3714 = vmatpush3.bf16.msra.mxu0 %v3711_v55 }
 0x394   :  { %3716 = vmatprep.subr.bf16.mxu0 %v3715_v39 }
 0x397   :  { %3718 = vmatpush3.bf16.msra.mxu0 %v3715_v39 }
 0x398   :  { %3720 = vmatprep.subr.bf16.mxu0 %v3719_v60 }
 0x39b   :  { %3722 = vmatpush3.bf16.msra.mxu0 %v3719_v60 }
 0x39c   :  { %3724 = vmatprep.subr.bf16.mxu0 %v3723_v13 }
 0x39f   :  { %3726 = vmatpush3.bf16.msra.mxu0 %v3723_v13 }
 0x3a0   :  { %3728 = vmatprep.subr.bf16.mxu0 %v3727_v15 }
 0x3a3   :  { %3730 = vmatpush3.bf16.msra.mxu0 %v3727_v15 }
 0x3a4   :  { %3732 = vmatprep.subr.bf16.mxu0 %v3731_v22 }
 0x3a7   :  { %3734 = vmatpush3.bf16.msra.mxu0 %v3731_v22 }
 0x3a8   :  { %3736 = vmatprep.subr.bf16.mxu0 %v4549_v43 }
 0x3aa   :  { %3154 = vmatmul.mubr.f32.vlgmr.msra.gmra.mrb[2].mxu0 %v4800_v1 }
 0x3ab   :  { %3738 = vmatpush3.bf16.msra.mxu0 %v4549_v43  ;;  %3188 = vmatprep.mubr.f32.mxu0 %v4802_v8  ;;  %v2236_v43 = vld [vmem:[%s4928_s6] ss:$0 sm:$0xff] }
 0x3ac   :  { %3740 = vmatprep.subr.bf16.mxu0 %v4555_v0 }
 0x3af   :  { %3742 = vmatpush3.bf16.msra.mxu0 %v4555_v0 }
 0x3b0   :  { %3744 = vmatprep.subr.bf16.mxu0 %v4644_v23 }
 0x3b3   :  { %3746 = vmatpush3.bf16.msra.mxu0 %v4644_v23 }
 0x3b4   :  { %3748 = vmatprep.subr.bf16.mxu0 %v4648_v50 }
 0x3b7   :  { %3750 = vmatpush3.bf16.msra.mxu0 %v4648_v50 }
 0x3b8   :  { %3752 = vmatprep.subr.bf16.mxu0 %v4652_v2 }
 0x3bb   :  { %3754 = vmatpush3.bf16.msra.mxu0 %v4652_v2 }
 0x3bc   :  { %3756 = vmatprep.subr.bf16.mxu0 %v4656_v40 }
 0x3bf   :  { %3758 = vmatpush3.bf16.msra.mxu0 %v4656_v40 }
 0x3c0   :  { %3760 = vmatprep.subr.bf16.mxu0 %v4660_v19 }
 0x3c3   :  { %3762 = vmatpush3.bf16.msra.mxu0 %v4660_v19 }
 0x3c4   :  { %3764 = vmatprep.subr.bf16.mxu0 %v4676_v6 }
 0x3c7   :  { %3766 = vmatpush3.bf16.msra.mxu0 %v4676_v6 }
 0x3ca   :  { %3189 = vmatmul.mubr.f32.vlgmr.msra.gmra.mrb[2].mxu0 %v4800_v1 }
 0x49d   :  { %v3190_v0 = vpop.f32.mrb[2].mxu0 }
 0x49e   :  { %v3773_v23 = vadd.f32 %v3190_v0, %v2236_v43  ;;  %v2203_v50 = vpop.f32.mrb[3].mxu0 }
 0x49f   :  { %v3774_v2 = vadd.f32 %v2236_v43, %v2203_v50 }
 0x4a0   :  { %2214 = vst [vmem:[#allocation10 + $0x8] sm:$0xff] %v3773_v23 }
 0x4a1   :  { %2213 = vst [vmem:[#allocation10] sm:$0xff] %v3774_v2 }
 0x4a2   :  { %3917 = shalt.err (!%p3914_p8)
}
 0x4a3   :  { %s3918_s6 = scalar_lea.hbm %s4929_s7, 256 }
 0x4a4   :  { %p3919_p9 = scmp.ne.s32.totalorder %s4929_s7, %s3918_s6  ;;  %p3922_p10 = scmp.lt.u32.totalorder %s3918_s6, %s4929_s7 }
 0x4a6   :  { %p3924_p11 = pnand %p3922_p10, %p3919_p9 }
 0x4a8   :  { %3927 = shalt.err (!%p3924_p11)
}
 0x4a9   :  { %2226 = dma.vmem_to_hbm [thread:$0]  %s2221_s8, 256, %s4929_s7, [#allocation4], %s3938_s13, %s3938_s13, %s3939_s14  }
 0x4aa   :  { %3934 = dma.done.wait [#allocation4], 256  }
 0x4ab   :  { %3935 = vsyncadd [#allocation4], 4294967040 }
 0x4ac   :  { %2230 = vsyncpa [#allocation3], 1 }
 0x4ad   :  { %2231 = vsyncpa [#allocation6], 1 }
 0x4ae   :  { %2232 = vsyncpa [#allocation9], 1 }
 0x4af   :  { %2233 = vsyncpa [#allocation4], 1 }

</bundles_post_ra>
